<compile_context>
chip_gen: v7x
topology: tpu7x:2x2x1
jax: 0.10.0
libtpu: 0.0.40
codegen_flags: <defaults>
</compile_context>

<pallas_src>
import functools

import jax
import jax.numpy as jnp
from jax.experimental import pallas as pl
from jax.experimental.pallas import tpu as pltpu


# ----------------------------------------------------------------------------
# Kernel 1: 3x3 conv (+ bias) as one K=9*Cin matmul, fused channel argmax one-hot.
# Outputs are channel-major (C on sublanes, H*W on lanes) -> lane-dense stores.
# ----------------------------------------------------------------------------
def _conv3x3_argmax_kernel(xp_ref, w_ref, b_ref, xc_ref, oh_ref, *, H, W):
    cin = xp_ref.shape[3]
    cout = w_ref.shape[0]

    xp = xp_ref[0]                                       # (H+2, W+2, Cin) in VMEM
    # Build the im2col patch matrix in VMEM from 9 shifted slices (no HBM blow-up).
    taps = [xp[dy:dy + H, dx:dx + W, :] for dy in range(3) for dx in range(3)]
    patches = jnp.concatenate(taps, axis=-1)             # (H, W, 9*Cin)
    patches = patches.reshape(H * W, 9 * cin)            # merge leading dims (cheap)

    # Single K=9*Cin MXU matmul; contraction over the last dims of both operands so the
    # result comes out channel-major (Cout sublanes x H*W lanes) with no extra transpose.
    # (bf16 operand cast would go here for v5e/v6e/v7x; kept f32 for exact parity.)
    yT = jax.lax.dot_general(w_ref[...], patches,
                             (((1,), (1,)), ((), ())),
                             preferred_element_type=jnp.float32)   # (Cout, H*W)
    yT = yT + b_ref[...]                                 # bias (Cout, 1) broadcast
    xc_ref[0] = yT.astype(xc_ref.dtype)                  # lane-dense store (H*W lanes)

    # Fused argmax over channels -> one-hot (first max wins, matching torch.argmax),
    # using only sublane reductions / iota / compare (no lane-axis reductions).
    m = jnp.max(yT, axis=0, keepdims=True)               # (1, H*W)
    cidx = jax.lax.broadcasted_iota(jnp.int32, yT.shape, 0)
    first = jnp.min(jnp.where(yT == m, cidx, cout), axis=0, keepdims=True)
    oh_ref[0] = (cidx == first).astype(oh_ref.dtype)     # lane-dense store


def conv3x3_argmax(x_pad, wT, b2, *, H, W):
    """x_pad: [N,H+2,W+2,Cin]; wT: [Cout,9*Cin]; b2: [Cout,1]
    -> (xc [N,Cout,H*W], onehot [N,Cout,H*W])."""
    N, Hp, Wp, Cin = x_pad.shape
    Cout = wT.shape[0]
    HW = H * W
    kernel = functools.partial(_conv3x3_argmax_kernel, H=H, W=W)
    return pl.pallas_call(
        kernel,
        out_shape=(jax.ShapeDtypeStruct((N, Cout, HW), jnp.float32),
                   jax.ShapeDtypeStruct((N, Cout, HW), jnp.float32)),
        grid_spec=pltpu.PrefetchScalarGridSpec(
            num_scalar_prefetch=0,
            grid=(N,),
            in_specs=[
                pl.BlockSpec((1, Hp, Wp, Cin), lambda n: (n, 0, 0, 0)),
                pl.BlockSpec((Cout, 9 * Cin), lambda n: (0, 0)),
                pl.BlockSpec((Cout, 1), lambda n: (0, 0)),
            ],
            out_specs=[
                pl.BlockSpec((1, Cout, HW), lambda n: (n, 0, 0)),
                pl.BlockSpec((1, Cout, HW), lambda n: (n, 0, 0)),
            ],
        ),
        compiler_params=pltpu.CompilerParams(
            dimension_semantics=("parallel",),
            vmem_limit_bytes=32 * 1024 * 1024,
        ),
    )(x_pad, wT, b2)


# ----------------------------------------------------------------------------
# Kernel 2: attention correction as ONE block-diagonal, lane-dense matmul per image.
#   out[l, c*PP+p] = sum_k attn[c,l,k] / (count_nonzero_k(attn[c,l,:]) + 1e-5) * unf[c,k,p]
# The per-class rowwise nonzero count is computed with one extra matmul against a
# constant block-ones matrix S (kron(I_C, ones(L2,L2))).
# ----------------------------------------------------------------------------
def _att_correction_kernel(a_ref, bd_ref, s_ref, o_ref):
    a = a_ref[0]                                                        # (L_att, C*L2)
    cnt = jnp.dot((a != 0.0).astype(jnp.float32), s_ref[...],
                  preferred_element_type=jnp.float32)                   # per-chunk nnz
    scaled = a / (cnt + 1e-5)
    o_ref[0] = jnp.dot(scaled, bd_ref[0],
                       preferred_element_type=jnp.float32).astype(o_ref.dtype)


def attention_correction(a, bd, s):
    """a: [N,L_att,C*L2]; bd: [N,C*L2,C*PP]; s: [C*L2,C*L2] -> [N,L_att,C*PP]."""
    N, L_att, CK = a.shape
    CPP = bd.shape[-1]
    return pl.pallas_call(
        _att_correction_kernel,
        out_shape=jax.ShapeDtypeStruct((N, L_att, CPP), jnp.float32),
        grid_spec=pltpu.PrefetchScalarGridSpec(
            num_scalar_prefetch=0,
            grid=(N,),
            in_specs=[
                pl.BlockSpec((1, L_att, CK), lambda n: (n, 0, 0)),
                pl.BlockSpec((1, CK, CPP), lambda n: (n, 0, 0)),
                pl.BlockSpec((CK, CK), lambda n: (0, 0)),
            ],
            out_specs=pl.BlockSpec((1, L_att, CPP), lambda n: (n, 0, 0)),
        ),
        compiler_params=pltpu.CompilerParams(
            dimension_semantics=("parallel",),
            vmem_limit_bytes=32 * 1024 * 1024,
        ),
    )(a, bd, s)


# ----------------------------------------------------------------------------
# Kernel 3: fused residual (c*x + x) + log_softmax over channels.
# Channel axis on sublanes (reductions over axis 0), spatial H*W on lanes.
# ----------------------------------------------------------------------------
def _residual_logsoftmax_kernel(x_ref, c_ref, o_ref):
    x = x_ref[0].astype(jnp.float32)                     # (C, T) — C on sublanes
    c = c_ref[0].astype(jnp.float32)
    y = c * x + x                                        # exact reference order
    m = jnp.max(y, axis=0, keepdims=True)
    z = y - m
    lse = jnp.log(jnp.sum(jnp.exp(z), axis=0, keepdims=True))
    o_ref[0] = (z - lse).astype(o_ref.dtype)


def _pick_lane_tile(total, cap=32768):
    """Largest lane-tile (multiple of 128) dividing `total`, capped; else full."""
    if total <= cap:
        return total
    t = cap - (cap % 128)
    while t >= 128:
        if total % t == 0:
            return t
        t -= 128
    return total


def residual_logsoftmax(xc_flat, corr_flat):
    """xc_flat, corr_flat: [N,C,H*W] -> [N,C,H*W] (log_softmax over C)."""
    N, C, HW = xc_flat.shape
    t = _pick_lane_tile(HW)
    grid = (N, HW // t)
    return pl.pallas_call(
        _residual_logsoftmax_kernel,
        out_shape=jax.ShapeDtypeStruct((N, C, HW), jnp.float32),
        grid_spec=pltpu.PrefetchScalarGridSpec(
            num_scalar_prefetch=0,
            grid=grid,
            in_specs=[
                pl.BlockSpec((1, C, t), lambda n, j: (n, 0, j)),
                pl.BlockSpec((1, C, t), lambda n, j: (n, 0, j)),
            ],
            out_specs=pl.BlockSpec((1, C, t), lambda n, j: (n, 0, j)),
        ),
        compiler_params=pltpu.CompilerParams(
            dimension_semantics=("parallel", "parallel"),
            vmem_limit_bytes=32 * 1024 * 1024,
        ),
    )(xc_flat, corr_flat)


# ----------------------------------------------------------------------------
# SegmentationHead forward (wrapper; small reshape/transpose glue stays in XLA)
# ----------------------------------------------------------------------------
def segmentation_head_forward(x_nchw, attentions, params, *,
                              patch_size, att_depth, upsampling=1):
    """x: [N,Cin,H,W]; attentions: [N,C,L_att,L2]; returns (log_softmax out NCHW, attentions)."""
    N, Cin, H, W = x_nchw.shape
    Cout = params["conv_w"].shape[-1]
    d = 2 ** att_depth
    psz = patch_size
    assert upsampling == 1  # TODO(synk): UpsamplingBilinear2d not implemented (default Identity)
    assert H % d == 0 and W % d == 0
    Hd, Wd = H // d, W // d
    assert H % psz == 0 and W % psz == 0 and Hd % psz == 0 and Wd % psz == 0
    Ph, Pw = H // psz, W // psz
    Ph2, Pw2 = Hd // psz, Wd // psz
    L_att, L2, PP = Ph * Pw, Ph2 * Pw2, psz * psz
    assert attentions.shape == (N, Cout, L_att, L2), attentions.shape

    # ---- kernel 1: conv + bias + fused argmax one-hot (pad only, no im2col in HBM) ----
    x_pad = jnp.pad(jnp.transpose(x_nchw, (0, 2, 3, 1)),
                    ((0, 0), (1, 1), (1, 1), (0, 0)))
    wT = jnp.transpose(params["conv_w"], (3, 0, 1, 2)).reshape(Cout, 9 * Cin)
    wT = wT.astype(jnp.float32)
    b2 = params["conv_b"].reshape(Cout, 1).astype(jnp.float32)
    xc_flat, onehot_flat = conv3x3_argmax(x_pad, wT, b2, H=H, W=W)   # (N,C,H*W) x2

    # ---- depthwise ones-conv stride d / d^2 == d x d mean pool, then Unfold (glue) ----
    oh = onehot_flat.reshape(N, Cout, H, W)
    pooled = oh.reshape(N, Cout, Hd, d, Wd, d).mean(axis=(3, 5))       # (N,C,Hd,Wd)
    unf = pooled.reshape(N, Cout, Ph2, psz, Pw2, psz)
    unf = jnp.transpose(unf, (0, 1, 2, 4, 3, 5)).reshape(N, Cout, L2, PP)

    # ---- kernel 2 operands: flattened-class lhs, block-diagonal rhs, chunk-sum matrix ----
    a = jnp.transpose(attentions.astype(jnp.float32), (0, 2, 1, 3))
    a = a.reshape(N, L_att, Cout * L2)
    eye = jnp.eye(Cout, dtype=jnp.float32)
    bd = (unf[:, :, :, None, :] * eye[None, :, None, :, None])
    bd = bd.reshape(N, Cout * L2, Cout * PP)
    s = jnp.kron(eye, jnp.ones((L2, L2), jnp.float32))                 # (C*L2, C*L2)

    att_all = attention_correction(a, bd, s)                           # (N,L_att,C*PP)

    # ---- Fold (pure reindex; XLA glue) ----
    corr = att_all.reshape(N, Ph, Pw, Cout, psz, psz)
    corr = jnp.transpose(corr, (0, 3, 1, 4, 2, 5)).reshape(N, Cout, H * W)

    # ---- kernel 3: fused residual + log_softmax over channels ----
    out_flat = residual_logsoftmax(xc_flat, corr)                      # (N,C,H*W)
    return out_flat.reshape(N, Cout, H, W), attentions


# ----------------------------------------------------------------------------
# Pure-JAX reference (correctness check, mirrors the torch module)
# ----------------------------------------------------------------------------
def segmentation_head_reference(x_nchw, attentions, params, *,
                                patch_size, att_depth, upsampling=1):
    w, b = params["conv_w"], params["conv_b"]
    psz = patch_size
    x_nhwc = jnp.transpose(x_nchw, (0, 2, 3, 1))
    xc = jax.lax.conv_general_dilated(
        x_nhwc, w, (1, 1), "SAME",
        dimension_numbers=("NHWC", "HWIO", "NHWC"))
    xc = jnp.transpose(xc, (0, 3, 1, 2)) + b.reshape(1, -1, 1, 1)
    N, C, H, W = xc.shape
    d = 2 ** att_depth
    Hd, Wd = H // d, W // d
    amax = jnp.argmax(xc, axis=1)
    onehot = (jnp.arange(C)[None, :, None, None] == amax[:, None, :, :]
              ).astype(jnp.float32)
    argx = onehot.reshape(N, C, Hd, d, Wd, d).mean(axis=(3, 5))
    Ph2, Pw2 = Hd // psz, Wd // psz
    unf = argx.reshape(N, C, Ph2, psz, Pw2, psz).transpose(0, 1, 2, 4, 3, 5)
    unf = unf.reshape(N, C, Ph2 * Pw2, psz * psz)
    nz = jnp.sum((attentions != 0).astype(jnp.float32), axis=-1, keepdims=True) + 1e-5
    att = jnp.einsum("nclk,nckp->nclp", attentions / nz, unf)
    Ph, Pw = H // psz, W // psz
    corr = att.reshape(N, C, Ph, Pw, psz, psz).transpose(0, 1, 2, 4, 3, 5)
    corr = corr.reshape(N, C, H, W)
    y = corr * xc + xc
    y = jax.nn.log_softmax(y, axis=1)
    return y, attentions


# ----------------------------------------------------------------------------
# Main
# ----------------------------------------------------------------------------
if __name__ == "__main__":
    # Shapes consistent with the module:
    #   in_channels=4, out_channels=8, kernel_size=3, patch_size=4, att_depth=1
    #   x: [2,4,16,16]; attentions: [N,C,L_att,L2] with L_att=(16/4)^2=16,
    #   L2=((16/2)/4)^2=4 -> [2,8,16,4]
    N, Cin, Cout = 2, 4, 8
    H = W = 16
    patch_size, att_depth = 4, 1
    d = 2 ** att_depth
    L_att = (H // patch_size) * (W // patch_size)
    L2 = ((H // d) // patch_size) * ((W // d) // patch_size)

    key = jax.random.PRNGKey(0)
    k = jax.random.split(key, 4)
    x = jax.random.normal(k[0], (N, Cin, H, W), jnp.float32)
    attentions = jax.nn.relu(
        jax.random.normal(k[1], (N, Cout, L_att, L2), jnp.float32))
    params = {
        # conv_x weights defined natively in HWIO (= torch [Cout,Cin,3,3] transposed)
        "conv_w": 0.2 * jax.random.normal(k[2], (3, 3, Cin, Cout), jnp.float32),
        "conv_b": 0.1 * jax.random.normal(k[3], (Cout,), jnp.float32),
    }

    fwd = jax.jit(functools.partial(segmentation_head_forward,
                                    patch_size=patch_size, att_depth=att_depth))
    out, att_out = fwd(x, attentions, params)
    out = jax.block_until_ready(out)

    ref, _ = segmentation_head_reference(x, attentions, params,
                                         patch_size=patch_size,
                                         att_depth=att_depth)
    ref = jax.block_until_ready(ref)

    assert out.shape == (N, Cout, H, W), out.shape
    max_err = float(jnp.max(jnp.abs(out - ref)))
    assert jnp.allclose(out, ref, atol=2e-4, rtol=2e-4), max_err

    print("KERNEL_OK")
</pallas_src>

<mosaic_0001>
module attributes {stable_mosaic.version = 11 : i64} {
  func.func @_conv3x3_argmax_kernel(%arg0: i32, %arg1: memref<1x18x18x4xf32, #tpu.memory_space<vmem>>, %arg2: memref<8x36xf32, #tpu.memory_space<vmem>>, %arg3: memref<8x1xf32, #tpu.memory_space<vmem>>, %arg4: memref<1x8x256xf32, #tpu.memory_space<vmem>>, %arg5: memref<1x8x256xf32, #tpu.memory_space<vmem>>) attributes {dimension_semantics = [#tpu.dimension_semantics<parallel>], iteration_bounds = array<i64: 2>, scalar_prefetch = 0 : i64, scratch_operands = 0 : i64, tpu.core_type = #tpu.core_type<tc>, window_params = [{transform_indices = @transform_0, window_bounds = array<i64: 1, 18, 18, 4>}, {pipeline_mode = #tpu.pipeline_mode<synchronous>, transform_indices = @transform_1, window_bounds = array<i64: 8, 36>}, {pipeline_mode = #tpu.pipeline_mode<synchronous>, transform_indices = @transform_2, window_bounds = array<i64: 8, 1>}, {transform_indices = @transform_3, window_bounds = array<i64: 1, 8, 256>}, {transform_indices = @transform_4, window_bounds = array<i64: 1, 8, 256>}]} {
    %c0 = arith.constant 0 : index
    %c0_0 = arith.constant 0 : index
    %c0_1 = arith.constant 0 : index
    %c0_2 = arith.constant 0 : index
    %0 = vector.load %arg1[%c0, %c0_0, %c0_1, %c0_2] : memref<1x18x18x4xf32, #tpu.memory_space<vmem>>, vector<1x18x18x4xf32>
    %1 = vector.shape_cast %0 : vector<1x18x18x4xf32> to vector<18x18x4xf32>
    %2 = vector.extract_strided_slice %1 {offsets = [0, 0, 0], sizes = [16, 16, 4], strides = [1, 1, 1]} : vector<18x18x4xf32> to vector<16x16x4xf32>
    %3 = vector.extract_strided_slice %1 {offsets = [0, 1, 0], sizes = [16, 16, 4], strides = [1, 1, 1]} : vector<18x18x4xf32> to vector<16x16x4xf32>
    %4 = vector.extract_strided_slice %1 {offsets = [0, 2, 0], sizes = [16, 16, 4], strides = [1, 1, 1]} : vector<18x18x4xf32> to vector<16x16x4xf32>
    %5 = vector.extract_strided_slice %1 {offsets = [1, 0, 0], sizes = [16, 16, 4], strides = [1, 1, 1]} : vector<18x18x4xf32> to vector<16x16x4xf32>
    %6 = vector.extract_strided_slice %1 {offsets = [1, 1, 0], sizes = [16, 16, 4], strides = [1, 1, 1]} : vector<18x18x4xf32> to vector<16x16x4xf32>
    %7 = vector.extract_strided_slice %1 {offsets = [1, 2, 0], sizes = [16, 16, 4], strides = [1, 1, 1]} : vector<18x18x4xf32> to vector<16x16x4xf32>
    %8 = vector.extract_strided_slice %1 {offsets = [2, 0, 0], sizes = [16, 16, 4], strides = [1, 1, 1]} : vector<18x18x4xf32> to vector<16x16x4xf32>
    %9 = vector.extract_strided_slice %1 {offsets = [2, 1, 0], sizes = [16, 16, 4], strides = [1, 1, 1]} : vector<18x18x4xf32> to vector<16x16x4xf32>
    %10 = vector.extract_strided_slice %1 {offsets = [2, 2, 0], sizes = [16, 16, 4], strides = [1, 1, 1]} : vector<18x18x4xf32> to vector<16x16x4xf32>
    %11 = tpu.concatenate %2, %3, %4, %5, %6, %7, %8, %9, %10 in 2 : vector<16x16x4xf32>, vector<16x16x4xf32>, vector<16x16x4xf32>, vector<16x16x4xf32>, vector<16x16x4xf32>, vector<16x16x4xf32>, vector<16x16x4xf32>, vector<16x16x4xf32>, vector<16x16x4xf32> -> vector<16x16x36xf32>
    %12 = vector.shape_cast %11 : vector<16x16x36xf32> to vector<256x36xf32>
    %c0_3 = arith.constant 0 : index
    %c0_4 = arith.constant 0 : index
    %13 = vector.load %arg2[%c0_3, %c0_4] : memref<8x36xf32, #tpu.memory_space<vmem>>, vector<8x36xf32>
    %cst = arith.constant dense<0.000000e+00> : vector<8x256xf32>
    %14 = tpu.matmul %13, %12, %cst {dimension_numbers = #tpu.dot_dimension_numbers<[1], [1], [0], [0], [0, 0, 1, 0], [], []>} : vector<8x36xf32>, vector<256x36xf32>, vector<8x256xf32> -> vector<8x256xf32>
    %c0_5 = arith.constant 0 : index
    %c0_6 = arith.constant 0 : index
    %15 = vector.load %arg3[%c0_5, %c0_6] : memref<8x1xf32, #tpu.memory_space<vmem>>, vector<8x1xf32>
    %16 = vector.broadcast %15 : vector<8x1xf32> to vector<8x256xf32>
    %17 = arith.addf %14, %16 : vector<8x256xf32>
    %c0_7 = arith.constant 0 : index
    %c0_8 = arith.constant 0 : index
    %c0_9 = arith.constant 0 : index
    %18 = vector.load %arg4[%c0_7, %c0_8, %c0_9] : memref<1x8x256xf32, #tpu.memory_space<vmem>>, vector<1x8x256xf32>
    %19 = vector.shape_cast %18 : vector<1x8x256xf32> to vector<8x256xf32>
    %20 = vector.shape_cast %17 : vector<8x256xf32> to vector<1x8x256xf32>
    tpu.vector_store %arg4[%c0_7, %c0_8, %c0_9], %20 {strides = array<i32>} : memref<1x8x256xf32, #tpu.memory_space<vmem>>, vector<1x8x256xf32>,
    %cst_10 = arith.constant dense<0xFF800000> : vector<256xf32>
    %21 = vector.multi_reduction <maximumf>, %17, %cst_10 [0] : vector<8x256xf32> to vector<256xf32>
    %22 = vector.shape_cast %21 : vector<256xf32> to vector<1x256xf32>
    %23 = tpu.iota {dimensions = array<i32: 0>} : vector<8x256xi32>
    %24 = vector.broadcast %22 : vector<1x256xf32> to vector<8x256xf32>
    %25 = arith.cmpf oeq, %17, %24 : vector<8x256xf32>
    %c8_i32 = arith.constant 8 : i32
    %26 = vector.broadcast %c8_i32 : i32 to vector<8x256xi32>
    %27 = arith.select %25, %23, %26 : vector<8x256xi1>, vector<8x256xi32>
    %cst_11 = arith.constant dense<2147483647> : vector<256xi32>
    %28 = vector.multi_reduction <minsi>, %27, %cst_11 [0] : vector<8x256xi32> to vector<256xi32>
    %29 = vector.shape_cast %28 : vector<256xi32> to vector<1x256xi32>
    %30 = vector.broadcast %29 : vector<1x256xi32> to vector<8x256xi32>
    %31 = arith.cmpi eq, %23, %30 : vector<8x256xi32>
    %32 = arith.extui %31 : vector<8x256xi1> to vector<8x256xi32>
    %33 = arith.sitofp %32 : vector<8x256xi32> to vector<8x256xf32>
    %c0_12 = arith.constant 0 : index
    %c0_13 = arith.constant 0 : index
    %c0_14 = arith.constant 0 : index
    %34 = vector.load %arg5[%c0_12, %c0_13, %c0_14] : memref<1x8x256xf32, #tpu.memory_space<vmem>>, vector<1x8x256xf32>
    %35 = vector.shape_cast %34 : vector<1x8x256xf32> to vector<8x256xf32>
    %36 = vector.shape_cast %33 : vector<8x256xf32> to vector<1x8x256xf32>
    tpu.vector_store %arg5[%c0_12, %c0_13, %c0_14], %36 {strides = array<i32>} : memref<1x8x256xf32, #tpu.memory_space<vmem>>, vector<1x8x256xf32>,
    return
  }
  func.func @transform_0(%arg0: i32) -> (i32, i32, i32, i32) {
    %c0_i32 = arith.constant 0 : i32
    %c0_i32_0 = arith.constant 0 : i32
    %c0_i32_1 = arith.constant 0 : i32
    %c0_i32_2 = arith.constant 0 : i32
    return %arg0, %c0_i32, %c0_i32_0, %c0_i32_1 : i32, i32, i32, i32
  }
  func.func @transform_1(%arg0: i32) -> (i32, i32) {
    %c0_i32 = arith.constant 0 : i32
    %c0_i32_0 = arith.constant 0 : i32
    %c0_i32_1 = arith.constant 0 : i32
    return %c0_i32, %c0_i32_0 : i32, i32
  }
  func.func @transform_2(%arg0: i32) -> (i32, i32) {
    %c0_i32 = arith.constant 0 : i32
    %c0_i32_0 = arith.constant 0 : i32
    %c0_i32_1 = arith.constant 0 : i32
    return %c0_i32, %c0_i32_0 : i32, i32
  }
  func.func @transform_3(%arg0: i32) -> (i32, i32, i32) {
    %c0_i32 = arith.constant 0 : i32
    %c0_i32_0 = arith.constant 0 : i32
    %c0_i32_1 = arith.constant 0 : i32
    return %arg0, %c0_i32, %c0_i32_0 : i32, i32, i32
  }
  func.func @transform_4(%arg0: i32) -> (i32, i32, i32) {
    %c0_i32 = arith.constant 0 : i32
    %c0_i32_0 = arith.constant 0 : i32
    %c0_i32_1 = arith.constant 0 : i32
    return %arg0, %c0_i32, %c0_i32_0 : i32, i32, i32
  }
}

module attributes {stable_mosaic.version = 11 : i64} {
  func.func @_att_correction_kernel(%arg0: i32, %arg1: memref<1x16x32xf32, #tpu.memory_space<vmem>>, %arg2: memref<1x32x128xf32, #tpu.memory_space<vmem>>, %arg3: memref<32x32xf32, #tpu.memory_space<vmem>>, %arg4: memref<1x16x128xf32, #tpu.memory_space<vmem>>) attributes {dimension_semantics = [#tpu.dimension_semantics<parallel>], iteration_bounds = array<i64: 2>, scalar_prefetch = 0 : i64, scratch_operands = 0 : i64, tpu.core_type = #tpu.core_type<tc>, window_params = [{transform_indices = @transform_0, window_bounds = array<i64: 1, 16, 32>}, {transform_indices = @transform_1, window_bounds = array<i64: 1, 32, 128>}, {pipeline_mode = #tpu.pipeline_mode<synchronous>, transform_indices = @transform_2, window_bounds = array<i64: 32, 32>}, {transform_indices = @transform_3, window_bounds = array<i64: 1, 16, 128>}]} {
    %c0 = arith.constant 0 : index
    %c0_0 = arith.constant 0 : index
    %c0_1 = arith.constant 0 : index
    %0 = vector.load %arg1[%c0, %c0_0, %c0_1] : memref<1x16x32xf32, #tpu.memory_space<vmem>>, vector<1x16x32xf32>
    %1 = vector.shape_cast %0 : vector<1x16x32xf32> to vector<16x32xf32>
    %cst = arith.constant 0.000000e+00 : f32
    %2 = vector.broadcast %cst : f32 to vector<16x32xf32>
    %3 = arith.cmpf one, %1, %2 : vector<16x32xf32>
    %4 = arith.extui %3 : vector<16x32xi1> to vector<16x32xi32>
    %5 = arith.sitofp %4 : vector<16x32xi32> to vector<16x32xf32>
    %c0_2 = arith.constant 0 : index
    %c0_3 = arith.constant 0 : index
    %6 = vector.load %arg3[%c0_2, %c0_3] : memref<32x32xf32, #tpu.memory_space<vmem>>, vector<32x32xf32>
    %cst_4 = arith.constant dense<0.000000e+00> : vector<16x32xf32>
    %7 = tpu.matmul %5, %6, %cst_4 {dimension_numbers = #tpu.dot_dimension_numbers<[1], [0], [0], [1], [0, 0, 1, 1], [], []>} : vector<16x32xf32>, vector<32x32xf32>, vector<16x32xf32> -> vector<16x32xf32>
    %cst_5 = arith.constant 9.99999974E-6 : f32
    %8 = vector.broadcast %cst_5 : f32 to vector<16x32xf32>
    %9 = arith.addf %7, %8 : vector<16x32xf32>
    %10 = arith.divf %1, %9 : vector<16x32xf32>
    %c0_6 = arith.constant 0 : index
    %c0_7 = arith.constant 0 : index
    %c0_8 = arith.constant 0 : index
    %11 = vector.load %arg2[%c0_6, %c0_7, %c0_8] : memref<1x32x128xf32, #tpu.memory_space<vmem>>, vector<1x32x128xf32>
    %12 = vector.shape_cast %11 : vector<1x32x128xf32> to vector<32x128xf32>
    %cst_9 = arith.constant dense<0.000000e+00> : vector<16x128xf32>
    %13 = tpu.matmul %10, %12, %cst_9 {dimension_numbers = #tpu.dot_dimension_numbers<[1], [0], [0], [1], [0, 0, 1, 1], [], []>} : vector<16x32xf32>, vector<32x128xf32>, vector<16x128xf32> -> vector<16x128xf32>
    %c0_10 = arith.constant 0 : index
    %c0_11 = arith.constant 0 : index
    %c0_12 = arith.constant 0 : index
    %14 = vector.load %arg4[%c0_10, %c0_11, %c0_12] : memref<1x16x128xf32, #tpu.memory_space<vmem>>, vector<1x16x128xf32>
    %15 = vector.shape_cast %14 : vector<1x16x128xf32> to vector<16x128xf32>
    %16 = vector.shape_cast %13 : vector<16x128xf32> to vector<1x16x128xf32>
    tpu.vector_store %arg4[%c0_10, %c0_11, %c0_12], %16 {strides = array<i32>} : memref<1x16x128xf32, #tpu.memory_space<vmem>>, vector<1x16x128xf32>,
    return
  }
  func.func @transform_0(%arg0: i32) -> (i32, i32, i32) {
    %c0_i32 = arith.constant 0 : i32
    %c0_i32_0 = arith.constant 0 : i32
    %c0_i32_1 = arith.constant 0 : i32
    return %arg0, %c0_i32, %c0_i32_0 : i32, i32, i32
  }
  func.func @transform_1(%arg0: i32) -> (i32, i32, i32) {
    %c0_i32 = arith.constant 0 : i32
    %c0_i32_0 = arith.constant 0 : i32
    %c0_i32_1 = arith.constant 0 : i32
    return %arg0, %c0_i32, %c0_i32_0 : i32, i32, i32
  }
  func.func @transform_2(%arg0: i32) -> (i32, i32) {
    %c0_i32 = arith.constant 0 : i32
    %c0_i32_0 = arith.constant 0 : i32
    %c0_i32_1 = arith.constant 0 : i32
    return %c0_i32, %c0_i32_0 : i32, i32
  }
  func.func @transform_3(%arg0: i32) -> (i32, i32, i32) {
    %c0_i32 = arith.constant 0 : i32
    %c0_i32_0 = arith.constant 0 : i32
    %c0_i32_1 = arith.constant 0 : i32
    return %arg0, %c0_i32, %c0_i32_0 : i32, i32, i32
  }
}

module attributes {stable_mosaic.version = 11 : i64} {
  func.func @_residual_logsoftmax_kernel(%arg0: i32, %arg1: i32, %arg2: memref<1x8x256xf32, #tpu.memory_space<vmem>>, %arg3: memref<1x8x256xf32, #tpu.memory_space<vmem>>, %arg4: memref<1x8x256xf32, #tpu.memory_space<vmem>>) attributes {dimension_semantics = [#tpu.dimension_semantics<parallel>, #tpu.dimension_semantics<parallel>], iteration_bounds = array<i64: 2, 1>, scalar_prefetch = 0 : i64, scratch_operands = 0 : i64, tpu.core_type = #tpu.core_type<tc>, window_params = [{transform_indices = @transform_0, window_bounds = array<i64: 1, 8, 256>}, {transform_indices = @transform_1, window_bounds = array<i64: 1, 8, 256>}, {transform_indices = @transform_2, window_bounds = array<i64: 1, 8, 256>}]} {
    %c0 = arith.constant 0 : index
    %c0_0 = arith.constant 0 : index
    %c0_1 = arith.constant 0 : index
    %0 = vector.load %arg2[%c0, %c0_0, %c0_1] : memref<1x8x256xf32, #tpu.memory_space<vmem>>, vector<1x8x256xf32>
    %1 = vector.shape_cast %0 : vector<1x8x256xf32> to vector<8x256xf32>
    %c0_2 = arith.constant 0 : index
    %c0_3 = arith.constant 0 : index
    %c0_4 = arith.constant 0 : index
    %2 = vector.load %arg3[%c0_2, %c0_3, %c0_4] : memref<1x8x256xf32, #tpu.memory_space<vmem>>, vector<1x8x256xf32>
    %3 = vector.shape_cast %2 : vector<1x8x256xf32> to vector<8x256xf32>
    %4 = arith.mulf %3, %1 : vector<8x256xf32>
    %5 = arith.addf %4, %1 : vector<8x256xf32>
    %cst = arith.constant dense<0xFF800000> : vector<256xf32>
    %6 = vector.multi_reduction <maximumf>, %5, %cst [0] : vector<8x256xf32> to vector<256xf32>
    %7 = vector.shape_cast %6 : vector<256xf32> to vector<1x256xf32>
    %8 = vector.broadcast %7 : vector<1x256xf32> to vector<8x256xf32>
    %9 = arith.subf %5, %8 : vector<8x256xf32>
    %10 = math.exp %9 : vector<8x256xf32>
    %cst_5 = arith.constant dense<0.000000e+00> : vector<256xf32>
    %11 = vector.multi_reduction <add>, %10, %cst_5 [0] : vector<8x256xf32> to vector<256xf32>
    %12 = vector.shape_cast %11 : vector<256xf32> to vector<1x256xf32>
    %13 = math.log %12 : vector<1x256xf32>
    %14 = vector.broadcast %13 : vector<1x256xf32> to vector<8x256xf32>
    %15 = arith.subf %9, %14 : vector<8x256xf32>
    %c0_6 = arith.constant 0 : index
    %c0_7 = arith.constant 0 : index
    %c0_8 = arith.constant 0 : index
    %16 = vector.load %arg4[%c0_6, %c0_7, %c0_8] : memref<1x8x256xf32, #tpu.memory_space<vmem>>, vector<1x8x256xf32>
    %17 = vector.shape_cast %16 : vector<1x8x256xf32> to vector<8x256xf32>
    %18 = vector.shape_cast %15 : vector<8x256xf32> to vector<1x8x256xf32>
    tpu.vector_store %arg4[%c0_6, %c0_7, %c0_8], %18 {strides = array<i32>} : memref<1x8x256xf32, #tpu.memory_space<vmem>>, vector<1x8x256xf32>,
    return
  }
  func.func @transform_0(%arg0: i32, %arg1: i32) -> (i32, i32, i32) {
    %c0_i32 = arith.constant 0 : i32
    %c0_i32_0 = arith.constant 0 : i32
    return %arg0, %c0_i32, %arg1 : i32, i32, i32
  }
  func.func @transform_1(%arg0: i32, %arg1: i32) -> (i32, i32, i32) {
    %c0_i32 = arith.constant 0 : i32
    %c0_i32_0 = arith.constant 0 : i32
    return %arg0, %c0_i32, %arg1 : i32, i32, i32
  }
  func.func @transform_2(%arg0: i32, %arg1: i32) -> (i32, i32, i32) {
    %c0_i32 = arith.constant 0 : i32
    %c0_i32_0 = arith.constant 0 : i32
    return %arg0, %c0_i32, %arg1 : i32, i32, i32
  }
}

</mosaic_0001>

<bundles_post_ra>
// kernel: segmentation_head_forward.4
= control target key start
LH: loop header
LB: loop body
LE: loop exit
PB: predicated region body
PF: predicated region fallthrough
CT: control target
= control target key end

     0   :  { %s557_s12 = smov 0   ;;  %s601_s0 = inlined_call_operand.vmem [shape: f32[2,16,32], index: 0, kind: input, shape index: {}]   ;;  %s602_s1 = inlined_call_operand.vmem [shape: f32[2,32,128], index: 1, kind: input, shape index: {}]   ;;  %s603_s2 = inlined_call_operand.vmem [shape: f32[32,32], index: 2, kind: input, shape index: {}]   ;;  %s604_s3 = inlined_call_operand.vmem [shape: f32[2,16,128], index: 3, kind: output, shape index: {}]  }
   0x1 LB: > { %s443_s13 = sadd.s32 4294967295, %s534_s12   ;;  %p447_p0 = scmp.ge.s32.totalorder %s534_s12, 1  ;;  %s534_s12 = sphi %s557_s12, %s13_s12  }
   0x2   : > { %p147_p1 = scmp.lt.s32.totalorder %s534_s12, 3 }
   0x4   : > { %p148_p2 = pnand %p447_p0, %p147_p1 }
   0x5   : > { %v199_v0 = vld [vmem:[%s603_s2] sm:$0xff] (!%p148_p2)  ;;  %v200_v1 = vld [vmem:[%s603_s2 + $0x8] sm:$0xff] (!%p148_p2)  ;;  %v201_v2 = vld [vmem:[%s603_s2 + $0x10] sm:$0xff] (!%p148_p2)  ;;  %p176_p3 = scmp.lt.s32.totalorder (!%p148_p2), %s443_s13, 1  ;;  %vm203_vm0 = vcmask (!%p148_p2), 261120   ;;  %v536_v8 = vmov (!%p148_p2), 0.0  }
   0x6   : > { %151 = sbr.rel (%p148_p2) target bundleno = 463 (0x1cf), region = 32  ;;  %v499_v3 = vpack.c.bf16 (!%p148_p2), %v200_v1, %v199_v0  ;;  %v202_v4 = vld [vmem:[%s603_s2 + $0x18] sm:$0xff] (!%p148_p2) }
   0x7   : > { %v503_v5 = vpack.c.bf16 (!%p148_p2), %v202_v4, %v201_v2 }
   0x8   : > { %500 = vmatprep.subr.bf16.mxu0 (!%p148_p2), %v499_v3 }
   0x9   : > { %502 = vmatpush3.bf16.msra.mxu0 (!%p148_p2), %v499_v3 }
   0xa   : > { %504 = vmatprep.subr.bf16.mxu0 (!%p148_p2), %v503_v5 }
   0xd   : > { %s606_s13 = smov (!%p176_p3, %s443_s13), 1  ;;  %506 = vmatpush3.bf16.msra.mxu0 %v503_v5 }
   0xe   : > { %s462_s22 = sshll.u32 %s606_s13, 4  ;;  %s463_s26 = sshll.u32 %s606_s13, 5 }
   0xf   : > { %s180_s25 = scalar_lea.vmem %s601_s0, %s462_s22  ;;  %s185_s29 = scalar_lea.vmem %s602_s1, %s463_s26 }
  0x10   : > { %v191_v6 = vld [vmem:[%s180_s25] sm:$0xff]  ;;  %v192_v7 = vld [vmem:[%s180_s25 + $0x8] sm:$0xff]  ;;  %v291_v13 = vld [vmem:[%s185_s29 + $0x10] sm:$0xff]  ;;  %s190_s5 = scalar_lea.vmem %s604_s3, %s462_s22 }
  0x11   : > { %vm193_vm1 = vcmp.ne.f32.partialorder %v191_v6, 0.0  ;;  %vm194_vm2 = vcmp.ne.f32.partialorder %v192_v7, 0.0  ;;  %v289_v11 = vld [vmem:[%s185_s29] sm:$0xff]  ;;  %v290_v12 = vld [vmem:[%s185_s29 + $0x8] sm:$0xff]  ;;  %v292_v15 = vld [vmem:[%s185_s29 + $0x18] sm:$0xff] }
  0x12   : > { %v454_v9 = vsel %vm193_vm1, 1.0, %v536_v8  ;;  %v455_v10 = vsel %vm194_vm2, 1.0, %v536_v8  ;;  %v507_v14 = vpack.c.bf16 %v290_v12, %v289_v11  ;;  %v511_v16 = vpack.c.bf16 %v292_v15, %v291_v13 }
  0x13   : > { %485 = vmatprep.mubr.msk.f32.mxu0 %vm203_vm0, %v454_v9 }
  0x14   : > { %486 = vmatmul.mubr.msk.f32.vlgmr.msra.gmra.mrb[0].mxu0 %vm203_vm0, %v455_v10  ;;  %508 = vmatprep.subr.bf16.mxu1 %v507_v14 }
  0x15   : > { %510 = vmatpush3.bf16.msra.mxu1 %v507_v14 }
  0x16   : > { %512 = vmatprep.subr.bf16.mxu1 %v511_v16 }
  0x19   : > { %514 = vmatpush3.bf16.msra.mxu1 %v511_v16 }
  0xe7   : > { %v487_v17 = vpop.f32.mrb[0].mxu0 }
  0xe8   : > { %v282_v18 = vadd.f32 1e-05, %v487_v17  ;;  %v276_v19 = vpop.f32.mrb[1].mxu0 }
  0xe9   : > { %v277_v20 = vadd.f32 1e-05, %v276_v19 }
  0xea   : > { %524 = vrcp.f32 %v282_v18 }
  0xeb   : > { %526 = vrcp.f32 %v277_v20 }
  0xf4   : > { %v525_v21 = vpop.eup %524 }
  0xf5   : > { %v527_v22 = vpop.eup %526  ;;  %v288_v24 = vmul.f32 %v525_v21, %v192_v7 }
  0xf6   : > { %v286_v23 = vmul.f32 %v527_v22, %v191_v6 }
  0xf8   : > { %496 = vmatprep.mubr.msk.f32.mxu1 %vm203_vm0, %v286_v23 }
  0xf9   : > { %497 = vmatmul.mubr.msk.f32.vlgmr.msra.gmra.mrb[0].mxu1 %vm203_vm0, %v288_v24 }
 0x1cc   : > { %v498_v25 = vpop.f32.mrb[0].mxu1 }
 0x1cd   : > { %375 = vst [vmem:[%s190_s5 + $0x8] sm:$0xff] %v498_v25  ;;  %v365_v26 = vpop.f32.mrb[1].mxu1 }
 0x1ce   : > { %374 = vst [vmem:[%s190_s5] sm:$0xff] %v365_v26 }
 0x1cf PF: > { %s13_s12 = sadd.s32 1, %s534_s12  }
 0x1d0   : > { %p10_p4 = scmp.ge.s32.totalorder %s13_s12, 4  }
 0x1d2   :  { %12 = sbr.rel (!%p10_p4) target bundleno = 1 (0x1), region = 65 }

// kernel: segmentation_head_forward.3
= control target key start
LH: loop header
LB: loop body
LE: loop exit
PB: predicated region body
PF: predicated region fallthrough
CT: control target
= control target key end

     0   :  { %s2692_s15 = smov 0   ;;  %s3923_s0 = inlined_call_operand.vmem [shape: f32[2,18,18,4], index: 0, kind: input, shape index: {}]   ;;  %s3924_s1 = inlined_call_operand.vmem [shape: f32[8,36], index: 1, kind: input, shape index: {}]   ;;  %s3925_s2 = inlined_call_operand.vmem [shape: f32[8,1], index: 2, kind: input, shape index: {}]   ;;  %s3926_s3 = inlined_call_operand.vmem [shape: f32[2,8,256], index: 3, kind: output, shape index: {0}]   ;;  %s3927_s4 = inlined_call_operand.vmem [shape: f32[2,8,256], index: 4, kind: output, shape index: {1}]  }
   0x1 LB: > { %s1845_s16 = sadd.s32 4294967295, %s2655_s15   ;;  %p1849_p0 = scmp.ge.s32.totalorder %s2655_s15, 1  ;;  %s2655_s15 = sphi %s2692_s15, %s15_s15  }
   0x2   : > { %p165_p1 = scmp.lt.s32.totalorder %s2655_s15, 3 }
   0x4   : > { %p166_p2 = pnand %p1849_p0, %p165_p1 }
   0x6   : > { %169 = sbr.rel (%p166_p2) target bundleno = 651 (0x28b), region = 32 }
   0xd   : > { %p196_p3 = scmp.lt.s32.totalorder %s1845_s16, 1  ;;  %vm313_vm0 = vcmask 1046528   ;;  %s2657_s21 = smov 4   ;;  %vm490_vm1 = vcmask 1045504   ;;  %vm1269_vm2 = vcmask 31744   ;;  %vm1302_vm3 = vcmask 64512  }
   0xe   : > { %s2658_s22 = smov 8   ;;  %s2659_s23 = smov 12   ;;  %vm1335_vm4 = vcmask 97280   ;;  %vm1368_vm5 = vcmask 130048   ;;  %vm1401_vm6 = vcmask 162816   ;;  %vm1434_vm7 = vcmask 195584  }
   0xf   : > { %s3999_s16 = smov (!%p196_p3, %s1845_s16), 1  ;;  %s2660_s24 = smov 16   ;;  %vm1467_vm8 = vcmask 228352   ;;  %vm1500_vm9 = vcmask 261120   ;;  %vm1540_vm10 = vcmask 293888  }
  0x10   : > { %s1976_s17 = smul.u32 432, %s3999_s16  ;;  %s2661_s25 = smov 20   ;;  %vm3500_vm11 = vmpackc.low %vm1540_vm10, %vm1540_vm10 }
  0x11   : > { %s2662_s26 = smov 24   ;;  %s2663_s27 = smov 28  }
  0x12   : > { %s2706_s20 = scalar_lea.vmem %s3923_s0, %s1976_s17  ;;  %s2664_s28 = smov 32  }
  0x13   : > { %v2709_v0 = vld [vmem:[%s2706_s20 + $0x30] sm:$0xff]  ;;  %v2712_v1 = vld [vmem:[%s2706_s20 + $0x38] sm:$0xff]  ;;  %v2715_v2 = vld [vmem:[%s2706_s20 + $0x40] sm:$0x3]  ;;  %s1892_s7 = sshll.u32 %s3999_s16, 4 }
  0x14   : > { %v324_v3 = vrot.slane %v2709_v0, 1  ;;  %v325_v4 = vrot.slane %v2712_v1, 1  ;;  %v327_v5 = vrot.slane %v2715_v2, 1  ;;  %v2721_v6 = vld [vmem:[%s2706_s20] sm:$0xff]  ;;  %v2724_v7 = vld [vmem:[%s2706_s20 + $0x8] sm:$0xff]  ;;  %v2735_v12 = vld [vmem:[%s2706_s20 + $0x50] sm:$0xff]  ;;  %s205_s10 = scalar_lea.vmem %s3926_s3, %s1892_s7  ;;  %s210_s13 = scalar_lea.vmem %s3927_s4, %s1892_s7 }
  0x15   : > { %v2727_v8 = vld [vmem:[%s2706_s20 + $0x10] sm:$0x3]  ;;  %v314_v9 = vrot.slane %v2721_v6, 1  ;;  %v315_v10 = vrot.slane %v2724_v7, 1  ;;  %v2732_v11 = vld [vmem:[%s2706_s20 + $0x48] sm:$0xff]  ;;  %v2744_v17 = vld [vmem:[%s2706_s20 + $0x18] sm:$0xff] }
  0x16   : > { %v326_v13 = vsel %vm313_vm0, %v324_v3, %v325_v4  ;;  %v328_v14 = vsel %vm313_vm0, %v325_v4, %v327_v5  ;;  %v317_v15 = vrot.slane %v2727_v8, 1  ;;  %v2741_v16 = vld [vmem:[%s2706_s20 + $0x58] sm:$0x3]  ;;  %v2747_v18 = vld [vmem:[%s2706_s20 + $0x20] sm:$0xff]  ;;  %v329_v21 = vrot.slane %v2732_v11, 1  ;;  %v2779_v36 = vld [vmem:[%s2706_s20 + $0x68] sm:$0xff] }
  0x17   : > { %v2749_v19 = vpack.i.bf16 %v328_v14, %v326_v13  ;;  %v316_v20 = vsel %vm313_vm0, %v314_v9, %v315_v10  ;;  %v330_v22 = vrot.slane %v2735_v12, 1  ;;  %v2755_v23 = vld [vmem:[%s2706_s20 + $0x28] sm:$0x3]  ;;  %v2758_v24 = vld [vmem:[%s2706_s20 + $0x78] sm:$0xff]  ;;  %v2761_v25 = vld [vmem:[%s2706_s20 + $0x80] sm:$0xff]  ;;  %v332_v27 = vrot.slane %v2741_v16, 1 }
  0x18   : > { %v318_v26 = vsel %vm313_vm0, %v315_v10, %v317_v15  ;;  %v319_v28 = vrot.slane %v2744_v17, 1  ;;  %v320_v29 = vrot.slane %v2747_v18, 1  ;;  %v2768_v30 = vld [vmem:[%s2706_s20 + $0x88] sm:$0x3]  ;;  %v2771_v31 = vld [vmem:[%s2706_s20 + $0x60] sm:$0xff]  ;;  %v322_v34 = vrot.slane %v2755_v23, 1 }
  0x19   : > { %3958 = vst [vmem:[#allocation2_spill] sm:$0xff] %v2749_v19  ;;  %2006 = vrot.lane.b32.xlu1 %v2749_v19, %s2657_s21  ;;  %v1995_v32 = vpack.i.bf16 %v318_v26, %v316_v20  ;;  %v331_v33 = vsel %vm313_vm0, %v329_v21, %v330_v22  ;;  %v339_v35 = vrot.slane %v2758_v24, 1  ;;  %v2782_v37 = vld [vmem:[%s2706_s20 + $0x70] sm:$0x3]  ;;  %v333_v38 = vsel %vm313_vm0, %v330_v22, %v332_v27  ;;  %v2789_v42 = vld [vmem:[%s2706_s20 + $0xa8] sm:$0xff]  ;;  %v2807_v50 = vld [vmem:[%s2706_s20 + $0x98] sm:$0xff] }
  0x1a   : > { %v321_v39 = vsel %vm313_vm0, %v319_v28, %v320_v29  ;;  %v340_v40 = vrot.slane %v2761_v25, 1  ;;  %v342_v41 = vrot.slane %v2768_v30, 1  ;;  %v2792_v43 = vld [vmem:[%s2706_s20 + $0xb0] sm:$0xff]  ;;  %v2795_v44 = vpack.i.bf16 %v333_v38, %v331_v33  ;;  %v2801_v48 = vld [vmem:[%s2706_s20 + $0xb8] sm:$0x3]  ;;  %v2828_v61 = vld [vmem:[%s2706_s20 + $0xe0] sm:$0xff] }
  0x1b   : > { %1996 = vrot.lane.b32.xlu0 %v1995_v32, %s2657_s21  ;;  %v323_v45 = vsel %vm313_vm0, %v320_v29, %v322_v34  ;;  %v334_v46 = vrot.slane %v2771_v31, 1  ;;  %v335_v47 = vrot.slane %v2779_v36, 1  ;;  %v2804_v49 = vld [vmem:[%s2706_s20 + $0x90] sm:$0xff]  ;;  %v337_v54 = vrot.slane %v2782_v37, 1  ;;  %v2815_v55 = vld [vmem:[%s2706_s20 + $0xa0] sm:$0x3] }
  0x1c   : > { %3959 = vst [vmem:[#allocation3_spill] sm:$0xff] %v2795_v44  ;;  %v2809_v51 = vpack.i.bf16 %v323_v45, %v321_v39  ;;  %v341_v52 = vsel %vm313_vm0, %v339_v35, %v340_v40  ;;  %v343_v53 = vsel %vm313_vm0, %v340_v40, %v342_v41  ;;  %v2818_v56 = vld [vmem:[%s2706_s20 + $0xd8] sm:$0xff]  ;;  %v349_v59 = vrot.slane %v2789_v42, 1  ;;  %v2831_v62 = vld [vmem:[%s2706_s20 + $0xe8] sm:$0x3]  ;;  %v2838_v9 = vld [vmem:[%s2706_s20 + $0xc0] sm:$0xff] }
  0x1d   : > { %2011 = vrot.lane.b32.xlu1 %v2795_v44, %s2657_s21  ;;  %v2822_v57 = vpack.i.bf16 %v343_v53, %v341_v52  ;;  %v336_v58 = vsel %vm313_vm0, %v334_v46, %v335_v47  ;;  %v350_v60 = vrot.slane %v2792_v43, 1  ;;  %v338_v63 = vsel %vm313_vm0, %v335_v47, %v337_v54  ;;  %v2841_v10 = vld [vmem:[%s2706_s20 + $0xc8] sm:$0xff]  ;;  %v2851_v21 = vld [vmem:[%s2706_s20 + $0xd0] sm:$0x3]  ;;  %v2871_v39 = vld [vmem:[%s2706_s20 + $0x118] sm:$0x3] }
  0x1e   : > { %3960 = vst [vmem:[#allocation4_spill] sm:$0xff] %v2809_v51  ;;  %v352_v3 = vrot.slane %v2801_v48, 1  ;;  %v344_v4 = vrot.slane %v2804_v49, 1  ;;  %v345_v5 = vrot.slane %v2807_v50, 1  ;;  %v2845_v13 = vpack.i.bf16 %v338_v63, %v336_v58  ;;  %v2858_v29 = vld [vmem:[%s2706_s20 + $0x108] sm:$0xff]  ;;  %v2861_v32 = vld [vmem:[%s2706_s20 + $0x110] sm:$0xff] }
  0x1f   : > { %3961 = vst [vmem:[#allocation5_spill] sm:$0xff] %v2822_v57  ;;  %2001 = vrot.lane.b32.xlu0 %v2809_v51, %s2657_s21  ;;  %v351_v14 = vsel %vm313_vm0, %v349_v59, %v350_v60  ;;  %v347_v15 = vrot.slane %v2815_v55, 1  ;;  %v359_v20 = vrot.slane %v2818_v56, 1  ;;  %v360_v27 = vrot.slane %v2828_v61, 1  ;;  %v2874_v40 = vld [vmem:[%s2706_s20 + $0xf0] sm:$0xff]  ;;  %v2877_v41 = vld [vmem:[%s2706_s20 + $0xf8] sm:$0xff] }
  0x20   : > { %3962 = vst [vmem:[#allocation6_spill] sm:$0xff] %v2845_v13  ;;  %v353_v22 = vsel %vm313_vm0, %v350_v60, %v352_v3  ;;  %v346_v26 = vsel %vm313_vm0, %v344_v4, %v345_v5  ;;  %v362_v28 = vrot.slane %v2831_v62, 1  ;;  %v354_v35 = vrot.slane %v2838_v9, 1  ;;  %v2883_v52 = vld [vmem:[%s2706_s20 + $0x100] sm:$0x3]  ;;  %v2886_v53 = vld [vmem:[%s2706_s20 + $0x138] sm:$0xff] }
  0x21   : > { %2021 = vrot.lane.b32.xlu1 %v2822_v57, %s2657_s21  ;;  %v2865_v33 = vpack.i.bf16 %v353_v22, %v351_v14  ;;  %v348_v34 = vsel %vm313_vm0, %v345_v5, %v347_v15  ;;  %v355_v38 = vrot.slane %v2841_v10, 1  ;;  %v361_v45 = vsel %vm313_vm0, %v359_v20, %v360_v27  ;;  %v2896_v63 = vld [vmem:[%s2706_s20 + $0x140] sm:$0xff]  ;;  %v2899_v3 = vld [vmem:[%s2706_s20 + $0x148] sm:$0x3]  ;;  %v2942_v44 = vld [vmem:[%s2706_s20 + $0x150] sm:$0xff] }
  0x22   : > { %v363_v46 = vsel %vm313_vm0, %v360_v27, %v362_v28  ;;  %v357_v47 = vrot.slane %v2851_v21, 1  ;;  %v2890_v54 = vpack.i.bf16 %v348_v34, %v346_v26  ;;  %v369_v59 = vrot.slane %v2858_v29, 1  ;;  %3965 = vst [vmem:[#allocation9_spill] sm:$0xff] %v2899_v3  ;;  %v2906_v20 = vld [vmem:[%s2706_s20 + $0x120] sm:$0xff]  ;;  %v2909_v22 = vld [vmem:[%s2706_s20 + $0x128] sm:$0xff]  ;;  %3970 = vst [vmem:[#allocation14_spill] sm:$0xff] %v2942_v44 }
  0x23   : > { %3963 = vst [vmem:[#allocation7_spill] sm:$0xff] %v2865_v33  ;;  %2016 = vrot.lane.b32.xlu0 %v2845_v13, %s2657_s21  ;;  %v356_v58 = vsel %vm313_vm0, %v354_v35, %v355_v38  ;;  %v370_v60 = vrot.slane %v2861_v32, 1  ;;  %v372_v5 = vrot.slane %v2871_v39, 1  ;;  %v364_v14 = vrot.slane %v2874_v40, 1  ;;  %3966 = vst [vmem:[#allocation10_spill] sm:$0xff] %v2906_v20  ;;  %v2945_v19 = vld [vmem:[%s2706_s20 + $0x158] sm:$0xff] }
  0x24   : > { %3964 = vst [vmem:[#allocation8_spill] sm:$0xff] %v2890_v54  ;;  %v358_v4 = vsel %vm313_vm0, %v355_v38, %v357_v47  ;;  %v365_v15 = vrot.slane %v2877_v41, 1  ;;  %3967 = vst [vmem:[#allocation11_spill] sm:$0xff] %v2909_v22  ;;  %v2913_v26 = vpack.i.bf16 %v363_v46, %v361_v45  ;;  %v367_v28 = vrot.slane %v2883_v52, 1  ;;  %v2919_v35 = vld [vmem:[%s2706_s20 + $0x130] sm:$0x3] }
  0x25   : > { %2031 = vrot.lane.b32.xlu1 %v2865_v33, %s2657_s21  ;;  %v371_v27 = vsel %vm313_vm0, %v369_v59, %v370_v60  ;;  %v379_v34 = vrot.slane %v2886_v53, 1  ;;  %v373_v38 = vsel %vm313_vm0, %v370_v60, %v372_v5  ;;  %v380_v33 = vrot.slane %v2896_v63, 1  ;;  %v2926_v46 = vld [vmem:[%s2706_s20 + $0x168] sm:$0xff]  ;;  %v2929_v59 = vld [vmem:[%s2706_s20 + $0x170] sm:$0xff] }
  0x26   : > { %3968 = vst [vmem:[#allocation12_spill] sm:$0xff] %v2913_v26  ;;  %v366_v47 = vsel %vm313_vm0, %v364_v14, %v365_v15  ;;  %v382_v45 = vrot.slane %v2899_v3, 1  ;;  %v2933_v57 = vpack.i.bf16 %v358_v4, %v356_v58  ;;  %v368_v13 = vsel %vm313_vm0, %v365_v15, %v367_v28  ;;  %v2939_v14 = vld [vmem:[%s2706_s20 + $0x178] sm:$0x3]  ;;  %v2951_v58 = vld [vmem:[%s2706_s20 + $0x160] sm:$0x3] }
  0x27   : > { %2026 = vrot.lane.b32.xlu0 %v2890_v54, %s2657_s21  ;;  %v374_v60 = vrot.slane %v2906_v20, 1  ;;  %v375_v5 = vrot.slane %v2909_v22, 1  ;;  %v381_v51 = vsel %vm313_vm0, %v379_v34, %v380_v33  ;;  %v377_v54 = vrot.slane %v2919_v35, 1 }
  0x28   : > { %3969 = vst [vmem:[#allocation13_spill] sm:$0xff] %v2933_v57  ;;  %v383_v3 = vsel %vm313_vm0, %v380_v33, %v382_v45  ;;  %v2955_v4 = vpack.i.bf16 %v373_v38, %v371_v27  ;;  %v2957_v15 = vpack.i.bf16 %v368_v13, %v366_v47  ;;  %v389_v28 = vrot.slane %v2926_v46, 1 }
  0x29   : > { %2041 = vrot.lane.b32.xlu1 %v2913_v26, %s2657_s21  ;;  %v390_v22 = vrot.slane %v2929_v59, 1  ;;  %v2961_v20 = vpack.i.bf16 %v383_v3, %v381_v51  ;;  %v392_v34 = vrot.slane %v2939_v14, 1  ;;  %v384_v33 = vrot.slane %v2942_v44, 1 }
  0x2a   : > { %3971 = vst [vmem:[#allocation15_spill] sm:$0xff] %v2955_v4  ;;  %v385_v45 = vrot.slane %v2945_v19, 1  ;;  %v376_v27 = vsel %vm313_vm0, %v374_v60, %v375_v5  ;;  %v378_v13 = vsel %vm313_vm0, %v375_v5, %v377_v54  ;;  %v387_v47 = vrot.slane %v2951_v58, 1 }
  0x2b   : > { %2036 = vrot.lane.b32.xlu0 %v2933_v57, %s2657_s21  ;;  %v391_v38 = vsel %vm313_vm0, %v389_v28, %v390_v22  ;;  %v393_v51 = vsel %vm313_vm0, %v390_v22, %v392_v34  ;;  %v496_v26 = vrot.slane %v2744_v17, 2  ;;  %v497_v44 = vrot.slane %v2747_v18, 2 }
  0x2c   : > { %v386_v3 = vsel %vm313_vm0, %v384_v33, %v385_v45  ;;  %v388_v57 = vsel %vm313_vm0, %v385_v45, %v387_v47  ;;  %v499_v60 = vrot.slane %v2755_v23, 2  ;;  %v491_v54 = vrot.slane %v2721_v6, 2 }
  0x2d   : > { %2051 = vrot.lane.b32.xlu1 %v2955_v4, %s2657_s21  ;;  %v492_v5 = vrot.slane %v2724_v7, 2  ;;  %v494_v22 = vrot.slane %v2727_v8, 2  ;;  %v2985_v28 = vpack.i.bf16 %v378_v13, %v376_v27  ;;  %v504_v34 = vrot.slane %v2715_v2, 2 }
  0x2e   : > { %v2988_v33 = vpack.i.bf16 %v393_v51, %v391_v38  ;;  %v2990_v4 = vpack.i.bf16 %v388_v57, %v386_v3  ;;  %v498_v6 = vsel %vm490_vm1, %v496_v26, %v497_v44  ;;  %v500_v7 = vsel %vm490_vm1, %v497_v44, %v499_v60 }
  0x2f   : > { %2046 = vrot.lane.b32.xlu0 %v2957_v15, %s2657_s21  ;;  %v493_v8 = vsel %vm490_vm1, %v491_v54, %v492_v5  ;;  %v506_v23 = vrot.slane %v2732_v11, 2  ;;  %v507_v45 = vrot.slane %v2735_v12, 2  ;;  %v509_v27 = vrot.slane %v2741_v16, 2 }
  0x30   : > { %3972 = vst [vmem:[#allocation16_spill] sm:$0xff] %v2988_v33  ;;  %v501_v2 = vrot.slane %v2709_v0, 2  ;;  %v502_v57 = vrot.slane %v2712_v1, 2  ;;  %v495_v13 = vsel %vm490_vm1, %v492_v5, %v494_v22  ;;  %v516_v26 = vrot.slane %v2758_v24, 2 }
  0x31   : > { %2061 = vrot.lane.b32.xlu1 %v2961_v20, %s2657_s21  ;;  %v517_v44 = vrot.slane %v2761_v25, 2  ;;  %v519_v38 = vrot.slane %v2768_v30, 2  ;;  %v3010_v47 = vpack.i.bf16 %v500_v7, %v498_v6  ;;  %v2075_v16 = vpack.i.bf16 %v495_v13, %v493_v8 }
  0x32   : > { %v508_v51 = vsel %vm490_vm1, %v506_v23, %v507_v45  ;;  %v510_v3 = vsel %vm490_vm1, %v507_v45, %v509_v27  ;;  %v503_v60 = vsel %vm490_vm1, %v501_v2, %v502_v57  ;;  %v505_v54 = vsel %vm490_vm1, %v502_v57, %v504_v34 }
  0x33   : > { %2056 = vrot.lane.b32.xlu0 %v2985_v28, %s2657_s21  ;;  %v518_v5 = vsel %vm490_vm1, %v516_v26, %v517_v44  ;;  %v520_v30 = vsel %vm490_vm1, %v517_v44, %v519_v38  ;;  %v511_v22 = vrot.slane %v2771_v31, 2  ;;  %v512_v6 = vrot.slane %v2779_v36, 2 }
  0x34   : > { %v514_v7 = vrot.slane %v2782_v37, 2  ;;  %v526_v8 = vrot.slane %v2789_v42, 2  ;;  %v527_v23 = vrot.slane %v2792_v43, 2  ;;  %v3027_v45 = vpack.i.bf16 %v510_v3, %v508_v51 }
  0x35   : > { %2071 = vrot.lane.b32.xlu1 %v2988_v33, %s2657_s21  ;;  %v529_v34 = vrot.slane %v2801_v48, 2  ;;  %v3030_v27 = vpack.i.bf16 %v505_v54, %v503_v60  ;;  %v3033_v2 = vpack.i.bf16 %v520_v30, %v518_v5  ;;  %v521_v37 = vrot.slane %v2804_v49, 2 }
  0x36   : > { %v522_v57 = vrot.slane %v2807_v50, 2  ;;  %v524_v13 = vrot.slane %v2815_v55, 2  ;;  %v513_v26 = vsel %vm490_vm1, %v511_v22, %v512_v6  ;;  %v515_v44 = vsel %vm490_vm1, %v512_v6, %v514_v7 }
  0x37   : > { %2066 = vrot.lane.b32.xlu0 %v2990_v4, %s2657_s21  ;;  %v528_v38 = vsel %vm490_vm1, %v526_v8, %v527_v23  ;;  %v536_v48 = vrot.slane %v2818_v56, 2  ;;  %v537_v51 = vrot.slane %v2828_v61, 2  ;;  %v539_v3 = vrot.slane %v2831_v62, 2 }
  0x38   : > { %v531_v60 = vrot.slane %v2838_v9, 2  ;;  %v532_v55 = vrot.slane %v2841_v10, 2  ;;  %v534_v54 = vrot.slane %v2851_v21, 2  ;;  %v546_v5 = vrot.slane %v2858_v29, 2 }
  0x39   : > { %2081 = vrot.lane.b32.xlu1 %v3010_v47, %s2658_s22  ;;  %v547_v30 = vrot.slane %v2861_v32, 2  ;;  %v3054_v22 = vpack.i.bf16 %v515_v44, %v513_v26  ;;  %v523_v6 = vsel %vm490_vm1, %v521_v37, %v522_v57  ;;  %v525_v7 = vsel %vm490_vm1, %v522_v57, %v524_v13 }
  0x3a   : > { %v549_v62 = vrot.slane %v2871_v39, 2  ;;  %v541_v8 = vrot.slane %v2874_v40, 2  ;;  %v544_v21 = vrot.slane %v2883_v52, 2  ;;  %v538_v26 = vsel %vm490_vm1, %v536_v48, %v537_v51  ;;  %v3973_v48 = vld [vmem:[#allocation9_spill] sm:$0xff] }
  0x3b   : > { %2076 = vrot.lane.b32.xlu0 %v2075_v16, %s2658_s22  ;;  %v530_v16 = vsel %vm490_vm1, %v527_v23, %v529_v34  ;;  %v542_v23 = vrot.slane %v2877_v41, 2  ;;  %v540_v44 = vsel %vm490_vm1, %v537_v51, %v539_v3  ;;  %v3068_v37 = vpack.i.bf16 %v525_v7, %v523_v6 }
  0x3c   : > { %v3064_v34 = vpack.i.bf16 %v530_v16, %v528_v38  ;;  %v533_v57 = vsel %vm490_vm1, %v531_v60, %v532_v55  ;;  %v535_v39 = vsel %vm490_vm1, %v532_v55, %v534_v54  ;;  %v548_v13 = vsel %vm490_vm1, %v546_v5, %v547_v30  ;;  %v3975_v55 = vld [vmem:[#allocation10_spill] sm:$0xff]  ;;  %v3976_v5 = vld [vmem:[#allocation11_spill] sm:$0xff] }
  0x3d   : > { %2091 = vrot.lane.b32.xlu1 %v3027_v45, %s2658_s22  ;;  %v550_v52 = vsel %vm490_vm1, %v547_v30, %v549_v62  ;;  %v556_v38 = vrot.slane %v2886_v53, 2  ;;  %v557_v16 = vrot.slane %v2896_v63, 2  ;;  %v559_v33 = vrot.slane %v3973_v48, 2 }
  0x3e   : > { %v3079_v51 = vpack.i.bf16 %v540_v44, %v538_v26  ;;  %v543_v3 = vsel %vm490_vm1, %v541_v8, %v542_v23  ;;  %v545_v60 = vsel %vm490_vm1, %v542_v23, %v544_v21  ;;  %v551_v54 = vrot.slane %v3975_v55, 2 }
  0x3f   : > { %2086 = vrot.lane.b32.xlu0 %v3030_v27, %s2658_s22  ;;  %v552_v6 = vrot.slane %v3976_v5, 2  ;;  %v554_v30 = vrot.slane %v2919_v35, 2  ;;  %v3088_v7 = vpack.i.bf16 %v535_v39, %v533_v57  ;;  %v3090_v62 = vpack.i.bf16 %v550_v52, %v548_v13  ;;  %v3977_v13 = vld [vmem:[#allocation14_spill] sm:$0xff] }
  0x40   : > { %3974 = vst [vmem:[#allocation9_spill] sm:$0xff] %v3079_v51  ;;  %v2125_v26 = vpack.i.bf16 %v545_v60, %v543_v3  ;;  %v558_v8 = vsel %vm490_vm1, %v556_v38, %v557_v16  ;;  %v560_v23 = vsel %vm490_vm1, %v557_v16, %v559_v33  ;;  %v566_v21 = vrot.slane %v2926_v46, 2 }
  0x41   : > { %2101 = vrot.lane.b32.xlu1 %v3033_v2, %s2658_s22  ;;  %v567_v44 = vrot.slane %v2929_v59, 2  ;;  %v553_v35 = vsel %vm490_vm1, %v551_v54, %v552_v6  ;;  %v555_v57 = vsel %vm490_vm1, %v552_v6, %v554_v30  ;;  %v569_v39 = vrot.slane %v2939_v14, 2 }
  0x42   : > { %v561_v52 = vrot.slane %v3977_v13, 2  ;;  %v562_v33 = vrot.slane %v2945_v19, 2  ;;  %v564_v38 = vrot.slane %v2951_v58, 2  ;;  %v3108_v16 = vpack.i.bf16 %v555_v57, %v553_v35 }
  0x43   : > { %2096 = vrot.lane.b32.xlu0 %v3054_v22, %s2658_s22  ;;  %v3112_v48 = vpack.i.bf16 %v560_v23, %v558_v8  ;;  %v568_v3 = vsel %vm490_vm1, %v566_v21, %v567_v44  ;;  %v570_v14 = vsel %vm490_vm1, %v567_v44, %v569_v39  ;;  %v2160_v30 = vpack.i.bf16 %v2712_v1, %v2709_v0  ;;  %v3978_v1 = vld [vmem:[#allocation12_spill] sm:$0xff] }
  0x44   : > { %v563_v60 = vsel %vm490_vm1, %v561_v52, %v562_v33  ;;  %v565_v54 = vsel %vm490_vm1, %v562_v33, %v564_v38  ;;  %v3121_v58 = vpack.i.bf16 %v570_v14, %v568_v3  ;;  %v2155_v8 = vpack.i.bf16 %v2747_v18, %v2744_v17  ;;  %v3979_v18 = vld [vmem:[#allocation4_spill] sm:$0xff]  ;;  %v3983_v38 = vld [vmem:[#allocation6_spill] sm:$0xff] }
  0x45   : > { %2111 = vrot.lane.b32.xlu1 %v3064_v34, %s2658_s22  ;;  %v3125_v6 = vpack.i.bf16 %v565_v54, %v563_v60  ;;  %v2170_v23 = vpack.i.bf16 %v2779_v36, %v2771_v31  ;;  %v2165_v21 = vpack.i.bf16 %v2735_v12, %v2732_v11  ;;  %v2175_v0 = vpack.i.bf16 %v2828_v61, %v2818_v56  ;;  %v3980_v56 = vld [vmem:[#allocation2_spill] sm:$0xff] }
  0x46   : > { %v2200_v17 = vpack.i.bf16 %v2877_v41, %v2874_v40  ;;  %v2255_v61 = vpack.i.bf16 %v2861_v32, %v2858_v29  ;;  %v3981_v40 = vld [vmem:[#allocation3_spill] sm:$0xff]  ;;  %v2310_v44 = vpack.i.bf16 %v3976_v5, %v3975_v55 }
  0x47   : > { %2106 = vrot.lane.b32.xlu0 %v3068_v37, %s2658_s22  ;;  %v3982_v41 = vld [vmem:[#allocation15_spill] sm:$0xff] }
  0x49   : > { %2121 = vrot.lane.b32.xlu1 %v3079_v51, %s2658_s22 }
  0x4b   : > { %2116 = vrot.lane.b32.xlu0 %v3088_v7, %s2658_s22 }
  0x4d   : > { %2131 = vrot.lane.b32.xlu1 %v3090_v62, %s2658_s22 }
  0x4f   : > { %2126 = vrot.lane.b32.xlu0 %v2125_v26, %s2658_s22 }
  0x51   : > { %2141 = vrot.lane.b32.xlu1 %v3112_v48, %s2658_s22 }
  0x53   : > { %2136 = vrot.lane.b32.xlu0 %v3108_v16, %s2658_s22 }
  0x55   : > { %2151 = vrot.lane.b32.xlu1 %v3121_v58, %s2658_s22 }
  0x57   : > { %2146 = vrot.lane.b32.xlu0 %v3125_v6, %s2658_s22 }
  0x59   : > { %2161 = vrot.lane.b32.xlu1 %v2160_v30, %s2659_s23 }
  0x5b   : > { %2156 = vrot.lane.b32.xlu0 %v2155_v8, %s2659_s23  ;;  %v2370_v8 = vpack.i.bf16 %v2761_v25, %v2758_v24 }
  0x5d   : > { %2171 = vrot.lane.b32.xlu1 %v2170_v23, %s2659_s23 }
  0x5f   : > { %2166 = vrot.lane.b32.xlu0 %v2165_v21, %s2659_s23 }
  0x61   : > { %2181 = vrot.lane.b32.xlu1 %v3978_v1, %s2660_s24 }
  0x63   : > { %2176 = vrot.lane.b32.xlu0 %v2175_v0, %s2659_s23 }
  0x65   : > { %2191 = vrot.lane.b32.xlu1 %v3079_v51, %s2661_s25 }
  0x67   : > { %2186 = vrot.lane.b32.xlu0 %v3979_v18, %s2660_s24 }
  0x69   : > { %2201 = vrot.lane.b32.xlu1 %v2200_v17, %s2662_s26 }
  0x6b   : > { %2196 = vrot.lane.b32.xlu0 %v3010_v47, %s2661_s25 }
  0x6d   : > { %2211 = vrot.lane.b32.xlu1 %v2957_v15, %s2663_s27 }
  0x6f   : > { %2206 = vrot.lane.b32.xlu0 %v2160_v30, %s2662_s26 }
  0x71   : > { %2221 = vrot.lane.b32.xlu1 %v2125_v26, %s2664_s28 }
  0x73   : > { %2216 = vrot.lane.b32.xlu0 %v3980_v56, %s2663_s27 }
  0x75   : > { %2231 = vrot.lane.b32.xlu1 %v2200_v17, %s2659_s23 }
  0x77   : > { %2226 = vrot.lane.b32.xlu0 %v3030_v27, %s2664_s28 }
  0x79   : > { %2241 = vrot.lane.b32.xlu1 %v3980_v56, %s2660_s24 }
  0x7b   : > { %2236 = vrot.lane.b32.xlu0 %v2957_v15, %s2660_s24 }
  0x7d   : > { %2251 = vrot.lane.b32.xlu1 %v3030_v27, %s2661_s25 }
  0x7f   : > { %2246 = vrot.lane.b32.xlu0 %v2125_v26, %s2661_s25 }
  0x81   : > { %2261 = vrot.lane.b32.xlu1 %v2165_v21, %s2662_s26  ;;  %v2365_v21 = vpack.i.bf16 %v2896_v63, %v2886_v53 }
  0x83   : > { %2256 = vrot.lane.b32.xlu0 %v2255_v61, %s2662_s26 }
  0x85   : > { %2271 = vrot.lane.b32.xlu1 %v3981_v40, %s2663_s27 }
  0x87   : > { %2266 = vrot.lane.b32.xlu0 %v3982_v41, %s2663_s27 }
  0x89   : > { %2281 = vrot.lane.b32.xlu1 %v3027_v45, %s2664_s28 }
  0x8b   : > { %2276 = vrot.lane.b32.xlu0 %v3090_v62, %s2664_s28  ;;  %v3185_v15 = vpop.permute.xlu1 %2006 }
  0x8d   : > { %v3187_v47 = vpop.permute.xlu0 %1996  ;;  %2291 = vrot.lane.b32.xlu1 %v3982_v41, %s2660_s24 }
  0x8f   : > { %2286 = vrot.lane.b32.xlu0 %v2255_v61, %s2659_s23  ;;  %v2012_v27 = vpop.permute.xlu1 %2011 }
  0x90   : > { %v2014_v0 = vunpack.i.h.bf16 %v2012_v27 }
  0x91   : > { %v3192_v26 = vpop.permute.xlu0 %2001  ;;  %2301 = vrot.lane.b32.xlu1 %v3090_v62, %s2661_s25 }
  0x93   : > { %2296 = vrot.lane.b32.xlu0 %v3981_v40, %s2660_s24  ;;  %v2022_v35 = vpop.permute.xlu1 %2021 }
  0x94   : > { %v2024_v40 = vunpack.i.h.bf16 %v2022_v35  ;;  %v2023_v41 = vunpack.i.l.bf16 %v2022_v35 }
  0x95   : > { %v3200_v57 = vpop.permute.xlu0 %2016  ;;  %2311 = vrot.lane.b32.xlu1 %v2310_v44, %s2662_s26 }
  0x97   : > { %2306 = vrot.lane.b32.xlu0 %v3027_v45, %s2661_s25  ;;  %v3205_v39 = vpop.permute.xlu1 %2031 }
  0x99   : > { %v3207_v52 = vpop.permute.xlu0 %2026  ;;  %2321 = vrot.lane.b32.xlu1 %v2985_v28, %s2663_s27 }
  0x9b   : > { %2316 = vrot.lane.b32.xlu0 %v2170_v23, %s2662_s26  ;;  %v3212_v62 = vpop.permute.xlu1 %2041 }
  0x9d   : > { %v3214_v33 = vpop.permute.xlu0 %2036  ;;  %2331 = vrot.lane.b32.xlu1 %v3108_v16, %s2664_s28 }
  0x9f   : > { %2326 = vrot.lane.b32.xlu0 %v3983_v38, %s2663_s27  ;;  %v3220_v45 = vpop.permute.xlu1 %2051 }
  0xa1   : > { %v3222_v3 = vpop.permute.xlu0 %2046  ;;  %2341 = vrot.lane.b32.xlu1 %v2310_v44, %s2659_s23  ;;  %v3985_v44 = vld [vmem:[#allocation5_spill] sm:$0xff] }
  0xa3   : > { %2336 = vrot.lane.b32.xlu0 %v3054_v22, %s2664_s28  ;;  %v3227_v14 = vpop.permute.xlu1 %2061 }
  0xa5   : > { %v3229_v60 = vpop.permute.xlu0 %2056  ;;  %2351 = vrot.lane.b32.xlu1 %v3983_v38, %s2660_s24 }
  0xa7   : > { %2346 = vrot.lane.b32.xlu0 %v2985_v28, %s2660_s24  ;;  %v3235_v54 = vpop.permute.xlu1 %2071  ;;  %v2013_v28 = vunpack.i.l.bf16 %v2012_v27 }
  0xa9   : > { %v3237_v30 = vpop.permute.xlu0 %2066  ;;  %2361 = vrot.lane.b32.xlu1 %v3054_v22, %s2661_s25  ;;  %v1276_v61 = vsel %vm1269_vm2, %v2732_v11, %v2013_v28  ;;  %v1281_v28 = vsel %vm1269_vm2, %v2761_v25, %v2024_v40  ;;  %v2028_v40 = vunpack.i.l.bf16 %v3207_v52 }
  0xab   : > { %2356 = vrot.lane.b32.xlu0 %v3108_v16, %s2661_s25  ;;  %v3245_v23 = vpop.permute.xlu1 %2081  ;;  %v1277_v16 = vsel %vm1269_vm2, %v2735_v12, %v2014_v0  ;;  %v2018_v12 = vunpack.i.l.bf16 %v3200_v57 }
  0xad   : > { %v3249_v17 = vpop.permute.xlu0 %2076  ;;  %2371 = vrot.lane.b32.xlu1 %v2370_v8, %s2662_s26 }
  0xaf   : > { %2366 = vrot.lane.b32.xlu0 %v2365_v21, %s2662_s26  ;;  %v2092_v22 = vpop.permute.xlu1 %2091 }
  0xb0   : > { %v2094_v18 = vunpack.i.h.bf16 %v2092_v22  ;;  %v2093_v56 = vunpack.i.l.bf16 %v2092_v22  ;;  %v2019_v22 = vunpack.i.h.bf16 %v3200_v57 }
  0xb1   : > { %v3257_v27 = vpop.permute.xlu0 %2086  ;;  %2381 = vrot.lane.b32.xlu1 %v3985_v44, %s2663_s27 }
  0xb2   : > { %3984 = vst [vmem:[#allocation10_spill] sm:$0xff] %v3257_v27  ;;  %v3262_v38 = vsel %vm1302_vm3, %v1277_v16, %v2094_v18  ;;  %v3265_v51 = vsel %vm1302_vm3, %v1276_v61, %v2093_v56  ;;  %v1280_v18 = vsel %vm1269_vm2, %v2758_v24, %v2023_v41  ;;  %v2034_v16 = vunpack.i.h.bf16 %v3205_v39 }
  0xb3   : > { %2376 = vrot.lane.b32.xlu0 %v2961_v20, %s2663_s27  ;;  %v2102_v11 = vpop.permute.xlu1 %2101  ;;  %v2033_v56 = vunpack.i.l.bf16 %v3205_v39  ;;  %v1279_v25 = vsel %vm1269_vm2, %v2779_v36, %v2019_v22  ;;  %v1278_v24 = vsel %vm1269_vm2, %v2771_v31, %v2018_v12  ;;  %v2029_v39 = vunpack.i.h.bf16 %v3207_v52 }
  0xb4   : > { %v2104_v35 = vunpack.i.h.bf16 %v2102_v11  ;;  %v2103_v0 = vunpack.i.l.bf16 %v2102_v11  ;;  %v1285_v36 = vsel %vm1269_vm2, %v2792_v43, %v2034_v16  ;;  %v1282_v16 = vsel %vm1269_vm2, %v2804_v49, %v2028_v40 }
  0xb5   : > { %v2097_v61 = vpop.permute.xlu0 %2096  ;;  %2391 = vrot.lane.b32.xlu1 %v3033_v2, %s2664_s28  ;;  %v1284_v31 = vsel %vm1269_vm2, %v2789_v42, %v2033_v56 }
  0xb6   : > { %v3280_v57 = vsel %vm1302_vm3, %v1281_v28, %v2104_v35  ;;  %v3283_v1 = vsel %vm1302_vm3, %v1280_v18, %v2103_v0  ;;  %v2099_v11 = vunpack.i.h.bf16 %v2097_v61  ;;  %v2098_v27 = vunpack.i.l.bf16 %v2097_v61 }
  0xb7   : > { %2386 = vrot.lane.b32.xlu0 %v3112_v48, %s2664_s28  ;;  %v2112_v41 = vpop.permute.xlu1 %2111 }
  0xb8   : > { %v3294_v35 = vsel %vm1302_vm3, %v1278_v24, %v2098_v27  ;;  %v3297_v0 = vsel %vm1302_vm3, %v1279_v25, %v2099_v11  ;;  %v2114_v28 = vunpack.i.h.bf16 %v2112_v41  ;;  %v2113_v18 = vunpack.i.l.bf16 %v2112_v41 }
  0xb9   : > { %v2107_v22 = vpop.permute.xlu0 %2106  ;;  %2401 = vrot.lane.b32.xlu1 %v2370_v8, %s2659_s23  ;;  %v1283_v11 = vsel %vm1269_vm2, %v2807_v50, %v2029_v39  ;;  %v2054_v24 = vunpack.i.h.bf16 %v3220_v45  ;;  %v2053_v41 = vunpack.i.l.bf16 %v3220_v45 }
  0xba   : > { %v3305_v52 = vsel %vm1302_vm3, %v1285_v36, %v2114_v28  ;;  %v3308_v27 = vsel %vm1302_vm3, %v1284_v31, %v2113_v18  ;;  %v2109_v12 = vunpack.i.h.bf16 %v2107_v22  ;;  %v2108_v61 = vunpack.i.l.bf16 %v2107_v22 }
  0xbb   : > { %2396 = vrot.lane.b32.xlu0 %v2365_v21, %s2659_s23  ;;  %v3315_v56 = vpop.permute.xlu1 %2121  ;;  %v2430_v18 = vpack.i.bf16 %v2807_v50, %v2804_v49  ;;  %v1293_v36 = vsel %vm1269_vm2, %v2861_v32, %v2054_v24  ;;  %v1292_v45 = vsel %vm1269_vm2, %v2858_v29, %v2053_v41  ;;  %v2064_v31 = vunpack.i.h.bf16 %v3227_v14 }
  0xbc   : > { %v3318_v8 = vsel %vm1302_vm3, %v1282_v16, %v2108_v61  ;;  %v3321_v25 = vsel %vm1302_vm3, %v1283_v11, %v2109_v12  ;;  %v2063_v22 = vunpack.i.l.bf16 %v3227_v14  ;;  %v2059_v50 = vunpack.i.h.bf16 %v3229_v60 }
  0xbd   : > { %v3325_v28 = vpop.permute.xlu0 %2116  ;;  %2411 = vrot.lane.b32.xlu1 %v3985_v44, %s2660_s24  ;;  %v2058_v32 = vunpack.i.l.bf16 %v3229_v60  ;;  %v2425_v14 = vpack.i.bf16 %v2945_v19, %v3977_v13  ;;  %v2074_v16 = vunpack.i.h.bf16 %v3235_v54  ;;  %v2073_v24 = vunpack.i.l.bf16 %v3235_v54 }
  0xbe   : > { %v1296_v11 = vsel %vm1269_vm2, %v2886_v53, %v2063_v22  ;;  %v2068_v54 = vunpack.i.l.bf16 %v3237_v30 }
  0xbf   : > { %2406 = vrot.lane.b32.xlu0 %v2961_v20, %s2660_s24  ;;  %v2132_v21 = vpop.permute.xlu1 %2131  ;;  %v1294_v53 = vsel %vm1269_vm2, %v3975_v55, %v2058_v32  ;;  %v1300_v55 = vsel %vm1269_vm2, %v2926_v46, %v2073_v24 }
  0xc0   : > { %v2134_v39 = vunpack.i.h.bf16 %v2132_v21  ;;  %v2133_v40 = vunpack.i.l.bf16 %v2132_v21 }
  0xc1   : > { %v3339_v44 = vpop.permute.xlu0 %2126  ;;  %2421 = vrot.lane.b32.xlu1 %v3033_v2, %s2661_s25  ;;  %v1297_v2 = vsel %vm1269_vm2, %v2896_v63, %v2064_v31  ;;  %v1295_v63 = vsel %vm1269_vm2, %v3976_v5, %v2059_v50  ;;  %v1301_v5 = vsel %vm1269_vm2, %v2929_v59, %v2074_v16  ;;  %v1298_v16 = vsel %vm1269_vm2, %v3977_v13, %v2068_v54 }
  0xc2   : > { %v3344_v20 = vsel %vm1302_vm3, %v1293_v36, %v2134_v39  ;;  %v3347_v49 = vsel %vm1302_vm3, %v1292_v45, %v2133_v40  ;;  %v2069_v40 = vunpack.i.h.bf16 %v3237_v30  ;;  %v3986_v30 = vld [vmem:[#allocation8_spill] sm:$0xff] }
  0xc3   : > { %2416 = vrot.lane.b32.xlu0 %v3112_v48, %s2661_s25  ;;  %v2142_v29 = vpop.permute.xlu1 %2141 }
  0xc4   : > { %v2144_v12 = vunpack.i.h.bf16 %v2142_v29  ;;  %v2143_v61 = vunpack.i.l.bf16 %v2142_v29 }
  0xc5   : > { %v2137_v60 = vpop.permute.xlu0 %2136  ;;  %2431 = vrot.lane.b32.xlu1 %v2430_v18, %s2662_s26 }
  0xc6   : > { %v3363_v48 = vsel %vm1302_vm3, %v1297_v2, %v2144_v12  ;;  %v3366_v41 = vsel %vm1302_vm3, %v1296_v11, %v2143_v61  ;;  %v2139_v21 = vunpack.i.h.bf16 %v2137_v60  ;;  %v2138_v39 = vunpack.i.l.bf16 %v2137_v60 }
  0xc7   : > { %2426 = vrot.lane.b32.xlu0 %v2425_v14, %s2662_s26  ;;  %v2152_v36 = vpop.permute.xlu1 %2151  ;;  %v1299_v11 = vsel %vm1269_vm2, %v2945_v19, %v2069_v40 }
  0xc8   : > { %v3376_v45 = vsel %vm1302_vm3, %v1294_v53, %v2138_v39  ;;  %v3379_v31 = vsel %vm1302_vm3, %v1295_v63, %v2139_v21  ;;  %v2154_v22 = vunpack.i.h.bf16 %v2152_v36  ;;  %v2153_v29 = vunpack.i.l.bf16 %v2152_v36 }
  0xc9   : > { %v2147_v50 = vpop.permute.xlu0 %2146  ;;  %2441 = vrot.lane.b32.xlu1 %v3986_v30, %s2663_s27 }
  0xca   : > { %v3388_v32 = vsel %vm1302_vm3, %v1301_v5, %v2154_v22  ;;  %v3391_v12 = vsel %vm1302_vm3, %v1300_v55, %v2153_v29  ;;  %v2149_v61 = vunpack.i.h.bf16 %v2147_v50  ;;  %v2148_v2 = vunpack.i.l.bf16 %v2147_v50  ;;  %v3444_v50 = vld [vmem:[%s2706_s20 + $0xa8] sm:$0xff] }
  0xcb   : > { %3987 = vst [vmem:[#allocation11_spill] sm:$0xff] %v3391_v12  ;;  %2436 = vrot.lane.b32.xlu0 %v2990_v4, %s2663_s27  ;;  %v3399_v24 = vpop.permute.xlu1 %2161  ;;  %v2038_v29 = vunpack.i.l.bf16 %v3214_v33  ;;  %v2119_v55 = vunpack.i.h.bf16 %v3325_v28 }
  0xcc   : > { %v3402_v60 = vsel %vm1302_vm3, %v1298_v16, %v2148_v2  ;;  %v3405_v21 = vsel %vm1302_vm3, %v1299_v11, %v2149_v61  ;;  %v2079_v2 = vunpack.i.h.bf16 %v3249_v17  ;;  %v2078_v11 = vunpack.i.l.bf16 %v3249_v17 }
  0xcd   : > { %v3407_v39 = vpop.permute.xlu0 %2156  ;;  %2451 = vrot.lane.b32.xlu1 %v3068_v37, %s2664_s28 }
  0xcf   : > { %2446 = vrot.lane.b32.xlu0 %v3125_v6, %s2664_s28  ;;  %v2172_v19 = vpop.permute.xlu1 %2171 }
  0xd0   : > { %v2174_v13 = vunpack.i.h.bf16 %v2172_v19  ;;  %v2173_v63 = vunpack.i.l.bf16 %v2172_v19  ;;  %v2158_v19 = vunpack.i.l.bf16 %v3407_v39 }
  0xd1   : > { %v3413_v53 = vpop.permute.xlu0 %2166  ;;  %2461 = vrot.lane.b32.xlu1 %v2430_v18, %s2659_s23 }
  0xd2   : > { %v3418_v40 = vsel %vm1335_vm4, %v3265_v51, %v2173_v63  ;;  %v3422_v54 = vsel %vm1335_vm4, %v3262_v38, %v2174_v13  ;;  %v2039_v51 = vunpack.i.h.bf16 %v3214_v33  ;;  %v2118_v38 = vunpack.i.l.bf16 %v3325_v28 }
  0xd3   : > { %2456 = vrot.lane.b32.xlu0 %v2425_v14, %s2659_s23  ;;  %v2182_v36 = vpop.permute.xlu1 %2181  ;;  %v2490_v14 = vpack.i.bf16 %v2792_v43, %v2789_v42  ;;  %v1999_v42 = vunpack.i.h.bf16 %v3187_v47  ;;  %v2159_v33 = vunpack.i.h.bf16 %v3407_v39 }
  0xd4   : > { %v1287_v28 = vsel %vm1269_vm2, %v2841_v10, %v2039_v51  ;;  %v2183_v13 = vunpack.i.l.bf16 %v2182_v36  ;;  %v2637_v51 = vld [vmem:[%s2706_s20 + $0x8] sm:$0xff] }
  0xd5   : > { %v2177_v22 = vpop.permute.xlu0 %2176  ;;  %2471 = vrot.lane.b32.xlu1 %v3986_v30, %s2660_s24 }
  0xd6   : > { %v2179_v30 = vunpack.i.h.bf16 %v2177_v22  ;;  %v2178_v61 = vunpack.i.l.bf16 %v2177_v22 }
  0xd7   : > { %2466 = vrot.lane.b32.xlu0 %v2990_v4, %s2660_s24  ;;  %v2192_v18 = vpop.permute.xlu1 %2191  ;;  %v3440_v4 = vpack.i.bf16 %v2929_v59, %v2926_v46  ;;  %v1998_v46 = vunpack.i.l.bf16 %v3187_v47  ;;  %v1286_v59 = vsel %vm1269_vm2, %v2838_v9, %v2038_v29  ;;  %v1320_v47 = vsel %vm1302_vm3, %v1287_v28, %v2119_v55 }
  0xd8   : > { %v2184_v9 = vunpack.i.h.bf16 %v2182_v36  ;;  %v1353_v63 = vsel %vm1335_vm4, %v1320_v47, %v2179_v30  ;;  %v2194_v22 = vunpack.i.h.bf16 %v2192_v18  ;;  %v2193_v29 = vunpack.i.l.bf16 %v2192_v18  ;;  %v3988_v18 = vld [vmem:[#allocation7_spill] sm:$0xff] }
  0xd9   : > { %v3432_v5 = vpop.permute.xlu0 %2186  ;;  %2481 = vrot.lane.b32.xlu1 %v3068_v37, %s2661_s25 }
  0xdb   : > { %2476 = vrot.lane.b32.xlu0 %v3125_v6, %s2661_s25  ;;  %v2202_v37 = vpop.permute.xlu1 %2201  ;;  %v1319_v6 = vsel %vm1302_vm3, %v1286_v59, %v2118_v38  ;;  %v1271_v38 = vsel %vm1269_vm2, %v2637_v51, %v1999_v42  ;;  %v3989_v51 = vld [vmem:[#allocation16_spill] sm:$0xff] }
  0xdc   : > { %v1352_v10 = vsel %vm1335_vm4, %v1319_v6, %v2178_v61  ;;  %v2204_v59 = vunpack.i.h.bf16 %v2202_v37  ;;  %v2203_v28 = vunpack.i.l.bf16 %v2202_v37  ;;  %v1304_v61 = vsel %vm1302_vm3, %v1271_v38, %v2079_v2 }
  0xdd   : > { %v3459_v16 = vpop.permute.xlu0 %2196  ;;  %2491 = vrot.lane.b32.xlu1 %v2490_v14, %s2662_s26  ;;  %v2638_v14 = vld [vmem:[%s2706_s20] sm:$0xff]  ;;  %v1385_v42 = vsel %vm1368_vm5, %v1352_v10, %v2183_v13  ;;  %v2189_v2 = vunpack.i.h.bf16 %v3432_v5 }
  0xde   : > { %v1270_v55 = vsel %vm1269_vm2, %v2638_v14, %v1998_v46  ;;  %v1386_v46 = vsel %vm1368_vm5, %v1353_v63, %v2184_v9  ;;  %v1418_v37 = vsel %vm1401_vm6, %v1385_v42, %v2193_v29  ;;  %v2199_v63 = vunpack.i.h.bf16 %v3459_v16  ;;  %v259_v14 = vld [vmem:[%s2706_s20 + $0x180] sm:$0xff] }
  0xdf   : > { %2486 = vrot.lane.b32.xlu0 %v3440_v4, %s2662_s26  ;;  %v2212_v17 = vpop.permute.xlu1 %2211  ;;  %v1303_v36 = vsel %vm1302_vm3, %v1270_v55, %v2078_v11  ;;  %v1419_v11 = vsel %vm1401_vm6, %v1386_v46, %v2194_v22  ;;  %v2198_v22 = vunpack.i.l.bf16 %v3459_v16  ;;  %v260_v55 = vld [vmem:[%s2706_s20 + $0x188] sm:$0xff]  ;;  %v261_v46 = vld [vmem:[%s2706_s20 + $0x190] sm:$0x3] }
  0xe0   : > { %v2214_v6 = vunpack.i.h.bf16 %v2212_v17  ;;  %v2213_v30 = vunpack.i.l.bf16 %v2212_v17  ;;  %v1336_v12 = vsel %vm1335_vm4, %v1303_v36, %v2158_v19  ;;  %v2188_v17 = vunpack.i.l.bf16 %v3432_v5 }
  0xe1   : > { %v2207_v47 = vpop.permute.xlu0 %2206  ;;  %2501 = vrot.lane.b32.xlu1 %v3988_v18, %s2663_s27  ;;  %v1451_v19 = vsel %vm1434_vm7, %v1418_v37, %v2203_v28  ;;  %v1452_v13 = vsel %vm1434_vm7, %v1419_v11, %v2204_v59  ;;  %v1337_v37 = vsel %vm1335_vm4, %v1304_v61, %v2159_v33  ;;  %v3992_v33 = vpack.i.bf16 %v2792_v43, %v3444_v50 }
  0xe2   : > { %v1484_v5 = vsel %vm1467_vm8, %v1451_v19, %v2213_v30  ;;  %v1485_v38 = vsel %vm1467_vm8, %v1452_v13, %v2214_v6  ;;  %v2209_v28 = vunpack.i.h.bf16 %v2207_v47  ;;  %v2208_v36 = vunpack.i.l.bf16 %v2207_v47 }
  0xe3   : > { %2496 = vrot.lane.b32.xlu0 %v3989_v51, %s2663_s27  ;;  %v2222_v39 = vpop.permute.xlu1 %2221  ;;  %v1370_v19 = vsel %vm1368_vm5, %v1337_v37, %v2189_v2  ;;  %v766_v13 = vrot.slane %v259_v14, 1  ;;  %v769_v61 = vrot.slane %v261_v46, 1  ;;  %v868_v50 = vrot.slane %v260_v55, 2 }
  0xe4   : > { %v2224_v9 = vunpack.i.h.bf16 %v2222_v39  ;;  %v2223_v10 = vunpack.i.l.bf16 %v2222_v39  ;;  %v1369_v39 = vsel %vm1368_vm5, %v1336_v12, %v2188_v17 }
  0xe5   : > { %v2217_v29 = vpop.permute.xlu0 %2216  ;;  %2511 = vrot.lane.b32.xlu1 %v3064_v34, %s2664_s28 }
  0xe6   : > { %v1517_v59 = vsel %vm1500_vm9, %v1484_v5, %v2223_v10  ;;  %v1518_v42 = vsel %vm1500_vm9, %v1485_v38, %v2224_v9  ;;  %v2219_v30 = vunpack.i.h.bf16 %v2217_v29  ;;  %v2218_v11 = vunpack.i.l.bf16 %v2217_v29 }
  0xe7   : > { %2506 = vrot.lane.b32.xlu0 %v3121_v58, %s2664_s28  ;;  %v3508_v6 = vpop.permute.xlu1 %2231  ;;  %v1928_v47 = vpack.c.bf16 %v1518_v42, %v1517_v59  ;;  %v767_v9 = vrot.slane %v260_v55, 1  ;;  %v1402_v10 = vsel %vm1401_vm6, %v1369_v39, %v2198_v22  ;;  %v1403_v5 = vsel %vm1401_vm6, %v1370_v19, %v2199_v63  ;;  %v2640_v39 = vld [vmem:[%s2706_s20 + $0xc8] sm:$0xff] }
  0xe8   : > { %v867_v29 = vrot.slane %v259_v14, 2  ;;  %v1435_v12 = vsel %vm1434_vm7, %v1402_v10, %v2208_v36  ;;  %v1436_v2 = vsel %vm1434_vm7, %v1403_v5, %v2209_v28  ;;  %v870_v42 = vrot.slane %v261_v46, 2 }
  0xe9   : > { %v2227_v38 = vpop.permute.xlu0 %2226  ;;  %2521 = vrot.lane.b32.xlu1 %v3992_v33, %s2659_s23  ;;  %1930 = vmatprep.subr.msk.bf16.mxu0 %vm3500_vm11, %v1928_v47  ;;  %v1468_v63 = vsel %vm1467_vm8, %v1435_v12, %v2218_v11  ;;  %v1469_v59 = vsel %vm1467_vm8, %v1436_v2, %v2219_v30  ;;  %v2639_v11 = vld [vmem:[%s2706_s20 + $0xc0] sm:$0xff]  ;;  %v770_v19 = vsel %vm313_vm0, %v767_v9, %v769_v61  ;;  %v2004_v46 = vunpack.i.h.bf16 %v3192_v26 }
  0xea   : > { %v2229_v17 = vunpack.i.h.bf16 %v2227_v38  ;;  %v2228_v22 = vunpack.i.l.bf16 %v2227_v38  ;;  %v3536_v30 = vpack.i.bf16 %v2640_v39, %v2639_v11  ;;  %v2003_v10 = vunpack.i.l.bf16 %v3192_v26 }
  0xeb   : > { %2516 = vrot.lane.b32.xlu0 %v3440_v4, %s2659_s23  ;;  %v3526_v43 = vpop.permute.xlu1 %2241  ;;  %v768_v4 = vsel %vm313_vm0, %v766_v13, %v767_v9  ;;  %v3542_v5 = vpack.i.bf16 %v260_v55, %v259_v14  ;;  %v2044_v38 = vunpack.i.h.bf16 %v3212_v62  ;;  %v869_v9 = vsel %vm490_vm1, %v867_v29, %v868_v50  ;;  %v2641_v29 = vld [vmem:[%s2706_s20 + $0x20] sm:$0xff] }
  0xec   : > { %v1501_v37 = vsel %vm1500_vm9, %v1468_v63, %v2228_v22  ;;  %v1502_v36 = vsel %vm1500_vm9, %v1469_v59, %v2229_v17  ;;  %v871_v26 = vsel %vm490_vm1, %v868_v50, %v870_v42  ;;  %v2084_v14 = vunpack.i.h.bf16 %v3245_v23  ;;  %v2642_v22 = vld [vmem:[%s2706_s20 + $0x18] sm:$0xff]  ;;  %v3569_v59 = vld [vmem:[%s2706_s20 + $0xe0] sm:$0xff] }
  0xed   : > { %v3530_v47 = vpop.permute.xlu0 %2236  ;;  %2531 = vrot.lane.b32.xlu1 %v3988_v18, %s2660_s24  ;;  %v1931_v28 = vpack.c.bf16 %v1502_v36, %v1501_v37  ;;  %v2043_v18 = vunpack.i.l.bf16 %v3212_v62  ;;  %v2083_v55 = vunpack.i.l.bf16 %v3245_v23  ;;  %v3554_v33 = vpack.i.bf16 %v770_v19, %v768_v4  ;;  %v3574_v50 = vld [vmem:[%s2706_s20 + $0xd8] sm:$0xff] }
  0xee   : > { %v2124_v62 = vunpack.i.h.bf16 %v3315_v56  ;;  %v2164_v61 = vunpack.i.h.bf16 %v3399_v24  ;;  %v2163_v12 = vunpack.i.l.bf16 %v3399_v24  ;;  %v1273_v17 = vsel %vm1269_vm2, %v2641_v29, %v2004_v46 }
  0xef   : > { %2526 = vrot.lane.b32.xlu0 %v3989_v51, %s2660_s24  ;;  %1933 = vmatpush3.bf16.xpose.msk.msra.mxu0 %vm3500_vm11, %v1931_v28  ;;  %v2252_v13 = vpop.permute.xlu1 %2251  ;;  %v2123_v51 = vunpack.i.l.bf16 %v3315_v56  ;;  %v1272_v23 = vsel %vm1269_vm2, %v2642_v22, %v2003_v10  ;;  %v3566_v63 = vpack.i.bf16 %v871_v26, %v869_v9  ;;  %v1289_v56 = vsel %vm1269_vm2, %v3569_v59, %v2044_v38 }
  0xf0   : > { %v1288_v24 = vsel %vm1269_vm2, %v3574_v50, %v2043_v18  ;;  %v2233_v42 = vunpack.i.l.bf16 %v3508_v6  ;;  %v1305_v36 = vsel %vm1302_vm3, %v1272_v23, %v2083_v55  ;;  %v1306_v28 = vsel %vm1302_vm3, %v1273_v17, %v2084_v14 }
  0xf1   : > { %v2247_v2 = vpop.permute.xlu0 %2246  ;;  %2541 = vrot.lane.b32.xlu1 %v3064_v34, %s2661_s25  ;;  %v2234_v34 = vunpack.i.h.bf16 %v3508_v6  ;;  %v2244_v11 = vunpack.i.h.bf16 %v3526_v43  ;;  %v2243_v39 = vunpack.i.l.bf16 %v3526_v43  ;;  %v1322_v4 = vsel %vm1302_vm3, %v1289_v56, %v2124_v62  ;;  %v3993_v56 = vld [vmem:[#allocation13_spill] sm:$0xff] }
  0xf2   : > { %v1321_v19 = vsel %vm1302_vm3, %v1288_v24, %v2123_v51  ;;  %v1338_v46 = vsel %vm1335_vm4, %v1305_v36, %v2163_v12  ;;  %v1339_v6 = vsel %vm1335_vm4, %v1306_v28, %v2164_v61  ;;  %v2238_v38 = vunpack.i.l.bf16 %v3530_v47 }
  0xf3   : > { %2536 = vrot.lane.b32.xlu0 %v3121_v58, %s2661_s25  ;;  %v2262_v37 = vpop.permute.xlu1 %2261  ;;  %v2239_v58 = vunpack.i.h.bf16 %v3530_v47  ;;  %v2254_v18 = vunpack.i.h.bf16 %v2252_v13  ;;  %v2253_v9 = vunpack.i.l.bf16 %v2252_v13  ;;  %v1354_v43 = vsel %vm1335_vm4, %v1321_v19, %v2233_v42 }
  0xf4   : > { %v1355_v26 = vsel %vm1335_vm4, %v1322_v4, %v2234_v34  ;;  %v2249_v14 = vunpack.i.h.bf16 %v2247_v2  ;;  %v2248_v55 = vunpack.i.l.bf16 %v2247_v2  ;;  %v1371_v51 = vsel %vm1368_vm5, %v1338_v46, %v2243_v39 }
  0xf5   : > { %v2257_v10 = vpop.permute.xlu0 %2256  ;;  %2551 = vrot.lane.b32.xlu1 %v3536_v30, %s2662_s26  ;;  %v1372_v61 = vsel %vm1368_vm5, %v1339_v6, %v2244_v11  ;;  %v2264_v12 = vunpack.i.h.bf16 %v2262_v37  ;;  %v2263_v29 = vunpack.i.l.bf16 %v2262_v37  ;;  %v1388_v2 = vsel %vm1368_vm5, %v1355_v26, %v2239_v58 }
  0xf6   : > { %v2259_v17 = vunpack.i.h.bf16 %v2257_v10  ;;  %v2258_v47 = vunpack.i.l.bf16 %v2257_v10  ;;  %v1387_v24 = vsel %vm1368_vm5, %v1354_v43, %v2238_v38  ;;  %v1404_v34 = vsel %vm1401_vm6, %v1371_v51, %v2253_v9  ;;  %v3624_v51 = vld [vmem:[%s2706_s20 + $0x1a0] sm:$0xff] }
  0xf7   : > { %2546 = vrot.lane.b32.xlu0 %v3542_v5, %s2662_s26  ;;  %v2272_v62 = vpop.permute.xlu1 %2271  ;;  %v1405_v42 = vsel %vm1401_vm6, %v1372_v61, %v2254_v18  ;;  %v1420_v36 = vsel %vm1401_vm6, %v1387_v24, %v2248_v55  ;;  %v1421_v37 = vsel %vm1401_vm6, %v1388_v2, %v2249_v14  ;;  %v1437_v4 = vsel %vm1434_vm7, %v1404_v34, %v2263_v29  ;;  %v264_v61 = vld [vmem:[%s2706_s20 + $0x1a8] sm:$0x3] }
  0xf8   : > { %v2274_v22 = vunpack.i.h.bf16 %v2272_v62  ;;  %v2273_v13 = vunpack.i.l.bf16 %v2272_v62  ;;  %v1438_v19 = vsel %vm1434_vm7, %v1405_v42, %v2264_v12  ;;  %v1453_v10 = vsel %vm1434_vm7, %v1420_v36, %v2258_v47  ;;  %v3621_v62 = vld [vmem:[%s2706_s20 + $0x198] sm:$0xff] }
  0xf9   : > { %v2267_v23 = vpop.permute.xlu0 %2266  ;;  %2561 = vrot.lane.b32.xlu1 %v3993_v56, %s2663_s27  ;;  %v1454_v58 = vsel %vm1434_vm7, %v1421_v37, %v2259_v17  ;;  %v1068_v24 = vrot.slane %v3624_v51, 1  ;;  %v1067_v34 = vrot.slane %v3621_v62, 1  ;;  %v1070_v42 = vrot.slane %v264_v61, 1 }
  0xfa   : > { %v2269_v28 = vunpack.i.h.bf16 %v2267_v23  ;;  %v2268_v11 = vunpack.i.l.bf16 %v2267_v23  ;;  %v1470_v38 = vsel %vm1467_vm8, %v1437_v4, %v2273_v13  ;;  %v1471_v18 = vsel %vm1467_vm8, %v1438_v19, %v2274_v22 }
  0xfb   : > { %2556 = vrot.lane.b32.xlu0 %v3554_v33, %s2663_s27  ;;  %v2282_v39 = vpop.permute.xlu1 %2281  ;;  %v2009_v36 = vunpack.i.h.bf16 %v3185_v15  ;;  %v2008_v37 = vunpack.i.l.bf16 %v3185_v15  ;;  %v1171_v4 = vrot.slane %v264_v61, 2  ;;  %v2049_v15 = vunpack.i.h.bf16 %v3222_v3 }
  0xfc   : > { %v2284_v46 = vunpack.i.h.bf16 %v2282_v39  ;;  %v2283_v6 = vunpack.i.l.bf16 %v2282_v39  ;;  %v1486_v12 = vsel %vm1467_vm8, %v1453_v10, %v2268_v11  ;;  %v1487_v29 = vsel %vm1467_vm8, %v1454_v58, %v2269_v28  ;;  %v2645_v10 = vld [vmem:[%s2706_s20 + $0x38] sm:$0xff] }
  0xfd   : > { %v2277_v9 = vpop.permute.xlu0 %2276  ;;  %2571 = vrot.lane.b32.xlu1 %v3088_v7, %s2664_s28  ;;  %v2048_v11 = vunpack.i.l.bf16 %v3222_v3  ;;  %v1168_v39 = vrot.slane %v3621_v62, 2  ;;  %v2128_v19 = vunpack.i.l.bf16 %v3339_v44  ;;  %v1275_v58 = vsel %vm1269_vm2, %v2645_v10, %v2009_v36 }
  0xfe   : > { %v1503_v43 = vsel %vm1500_vm9, %v1470_v38, %v2283_v6  ;;  %v1504_v26 = vsel %vm1500_vm9, %v1471_v18, %v2284_v46  ;;  %v2279_v14 = vunpack.i.h.bf16 %v2277_v9  ;;  %v2278_v55 = vunpack.i.l.bf16 %v2277_v9  ;;  %v2646_v9 = vld [vmem:[%s2706_s20 + $0x30] sm:$0xff] }
  0xff   : > { %2566 = vrot.lane.b32.xlu0 %v3566_v63, %s2664_s28  ;;  %v3631_v17 = vpop.permute.xlu1 %2291  ;;  %v1937_v47 = vpack.c.bf16 %v1504_v26, %v1503_v43  ;;  %v3657_v46 = vsel %vm313_vm0, %v1067_v34, %v1068_v24  ;;  %v3660_v6 = vsel %vm313_vm0, %v1068_v24, %v1070_v42  ;;  %v2129_v3 = vunpack.i.h.bf16 %v3339_v44 }
 0x100   : > { %v1519_v22 = vsel %vm1500_vm9, %v1486_v12, %v2278_v55  ;;  %v1520_v13 = vsel %vm1500_vm9, %v1487_v29, %v2279_v14  ;;  %v2610_v38 = vpack.i.bf16 %v3569_v59, %v3574_v50  ;;  %v2605_v18 = vpack.i.bf16 %v3624_v51, %v3621_v62  ;;  %v2647_v55 = vld [vmem:[%s2706_s20 + $0xf0] sm:$0xff]  ;;  %v2648_v62 = vld [vmem:[%s2706_s20 + $0xf8] sm:$0xff]  ;;  %v3994_v12 = vld [vmem:[#allocation10_spill] sm:$0xff] }
 0x101   : > { %v1934_v23 = vpack.c.bf16 %v1520_v13, %v1519_v22  ;;  %v2287_v2 = vpop.permute.xlu0 %2286  ;;  %2581 = vrot.lane.b32.xlu1 %v3536_v30, %s2659_s23  ;;  %v1169_v30 = vrot.slane %v3624_v51, 2  ;;  %v1290_v61 = vsel %vm1269_vm2, %v2647_v55, %v2048_v11  ;;  %v2615_v44 = vpack.i.bf16 %v3660_v6, %v3657_v46  ;;  %v3717_v55 = vld [vmem:[%s3924_s1] sm:$0xff] }
 0x102   : > { %v2289_v43 = vunpack.i.h.bf16 %v2287_v2  ;;  %v2288_v26 = vunpack.i.l.bf16 %v2287_v2  ;;  %v1291_v51 = vsel %vm1269_vm2, %v2648_v62, %v2049_v15  ;;  %v2089_v29 = vunpack.i.h.bf16 %v3994_v12  ;;  %1926 = vmatprep.mubr.msk.f32.mxu0 %vm1540_vm10, %v3717_v55 }
 0x103   : > { %2576 = vrot.lane.b32.xlu0 %v3542_v5, %s2659_s23  ;;  %1936 = vmatprep.subr.msk.bf16.mxu0 %vm3500_vm11, %v1934_v23  ;;  %v2302_v28 = vpop.permute.xlu1 %2301  ;;  %v3678_v59 = vsel %vm490_vm1, %v1168_v39, %v1169_v30  ;;  %v3681_v50 = vsel %vm490_vm1, %v1169_v30, %v1171_v4  ;;  %v1324_v13 = vsel %vm1302_vm3, %v1291_v51, %v2129_v3  ;;  %v2168_v23 = vunpack.i.l.bf16 %v3413_v53 }
 0x104   : > { %1939 = vmatpush3.bf16.xpose.msk.msra.mxu0 %vm3500_vm11, %v1937_v47  ;;  %v1323_v47 = vsel %vm1302_vm3, %v1290_v61, %v2128_v19  ;;  %v2294_v2 = vunpack.i.h.bf16 %v3631_v17  ;;  %v2293_v24 = vunpack.i.l.bf16 %v3631_v17  ;;  %v1357_v42 = vsel %vm1335_vm4, %v1324_v13, %v2289_v43 }
 0x105   : > { %v3652_v5 = vpop.permute.xlu0 %2296  ;;  %2591 = vrot.lane.b32.xlu1 %v3993_v56, %s2660_s24  ;;  %v1274_v56 = vsel %vm1269_vm2, %v2646_v9, %v2008_v37  ;;  %v1356_v34 = vsel %vm1335_vm4, %v1323_v47, %v2288_v26  ;;  %v2304_v36 = vunpack.i.h.bf16 %v2302_v28  ;;  %v2303_v37 = vunpack.i.l.bf16 %v2302_v28 }
 0x106   : > { %v2625_v39 = vpack.i.bf16 %v3681_v50, %v3678_v59  ;;  %v1308_v4 = vsel %vm1302_vm3, %v1275_v58, %v2089_v29  ;;  %v2169_v28 = vunpack.i.h.bf16 %v3413_v53  ;;  %v1390_v10 = vsel %vm1368_vm5, %v1357_v42, %v2294_v2 }
 0x107   : > { %2586 = vrot.lane.b32.xlu0 %v3554_v33, %s2660_s24  ;;  %v2312_v14 = vpop.permute.xlu1 %2311  ;;  %v2088_v33 = vunpack.i.l.bf16 %v3994_v12  ;;  %v1423_v9 = vsel %vm1401_vm6, %v1390_v10, %v2304_v36  ;;  %v2299_v58 = vunpack.i.h.bf16 %v3652_v5 }
 0x108   : > { %v2314_v30 = vunpack.i.h.bf16 %v2312_v14  ;;  %v1341_v47 = vsel %vm1335_vm4, %v1308_v4, %v2169_v28 }
 0x109   : > { %v2307_v22 = vpop.permute.xlu0 %2306  ;;  %2601 = vrot.lane.b32.xlu1 %v3088_v7, %s2661_s25  ;;  %v2313_v7 = vunpack.i.l.bf16 %v2312_v14  ;;  %v1307_v15 = vsel %vm1302_vm3, %v1274_v56, %v2088_v33  ;;  %v2298_v56 = vunpack.i.l.bf16 %v3652_v5 }
 0x10a   : > { %v1340_v6 = vsel %vm1335_vm4, %v1307_v15, %v2168_v23  ;;  %v1456_v53 = vsel %vm1434_vm7, %v1423_v9, %v2314_v30  ;;  %v2309_v61 = vunpack.i.h.bf16 %v2307_v22  ;;  %v2308_v59 = vunpack.i.l.bf16 %v2307_v22 }
 0x10b   : > { %2596 = vrot.lane.b32.xlu0 %v3566_v63, %s2661_s25  ;;  %v2322_v11 = vpop.permute.xlu1 %2321  ;;  %v1389_v63 = vsel %vm1368_vm5, %v1356_v34, %v2293_v24  ;;  %v1373_v24 = vsel %vm1368_vm5, %v1340_v6, %v2298_v56  ;;  %v1374_v34 = vsel %vm1368_vm5, %v1341_v47, %v2299_v58  ;;  %v2665_v6 = vmov 0  }
 0x10c   : > { %v2324_v17 = vunpack.i.h.bf16 %v2322_v11  ;;  %v2323_v19 = vunpack.i.l.bf16 %v2322_v11  ;;  %v1422_v3 = vsel %vm1401_vm6, %v1389_v63, %v2303_v37  ;;  %v1406_v42 = vsel %vm1401_vm6, %v1373_v24, %v2308_v59  ;;  %v3996_v11 = vld [vmem:[#allocation9_spill] sm:$0xff]  ;;  %2635 = vset.pattern.permute.xlu0 %v2665_v6  ;;  %v1534_v63 = vld [vmem:[%s3925_s2] sm:$0xff] }
 0x10d   : > { %v2317_v46 = vpop.permute.xlu0 %2316  ;;  %2611 = vrot.lane.b32.xlu1 %v2610_v38, %s2662_s26  ;;  %v1455_v38 = vsel %vm1434_vm7, %v1422_v3, %v2313_v7  ;;  %v1407_v36 = vsel %vm1401_vm6, %v1374_v34, %v2309_v61 }
 0x10e   : > { %v1488_v50 = vsel %vm1467_vm8, %v1455_v38, %v2323_v19  ;;  %v1489_v5 = vsel %vm1467_vm8, %v1456_v53, %v2324_v17  ;;  %v2319_v51 = vunpack.i.h.bf16 %v2317_v46  ;;  %v2318_v12 = vunpack.i.l.bf16 %v2317_v46 }
 0x10f   : > { %2606 = vrot.lane.b32.xlu0 %v2605_v18, %s2662_s26  ;;  %v2332_v43 = vpop.permute.xlu1 %2331  ;;  %v3995_v18 = vld [vmem:[#allocation12_spill] sm:$0xff] }
 0x110   : > { %v2334_v26 = vunpack.i.h.bf16 %v2332_v43  ;;  %v2333_v14 = vunpack.i.l.bf16 %v2332_v43  ;;  %v1439_v30 = vsel %vm1434_vm7, %v1406_v42, %v2318_v12 }
 0x111   : > { %v2327_v62 = vpop.permute.xlu0 %2326  ;;  %2621 = vrot.lane.b32.xlu1 %v3995_v18, %s2663_s27 }
 0x112   : > { %v1521_v29 = vsel %vm1500_vm9, %v1488_v50, %v2333_v14  ;;  %v1522_v33 = vsel %vm1500_vm9, %v1489_v5, %v2334_v26  ;;  %v2329_v13 = vunpack.i.h.bf16 %v2327_v62  ;;  %v2328_v23 = vunpack.i.l.bf16 %v2327_v62 }
 0x113   : > { %v1940_v22 = vpack.c.bf16 %v1522_v33, %v1521_v29  ;;  %2616 = vrot.lane.b32.xlu0 %v2615_v44, %s2663_s27  ;;  %v2342_v2 = vpop.permute.xlu1 %2341  ;;  %v1440_v44 = vsel %vm1434_vm7, %v1407_v36, %v2319_v51 }
 0x114   : > { %v1472_v15 = vsel %vm1467_vm8, %v1439_v30, %v2328_v23  ;;  %v1473_v17 = vsel %vm1467_vm8, %v1440_v44, %v2329_v13  ;;  %v2343_v56 = vunpack.i.l.bf16 %v2342_v2 }
 0x115   : > { %v2337_v37 = vpop.permute.xlu0 %2336  ;;  %2631 = vrot.lane.b32.xlu1 %v3996_v11, %s2664_s28  ;;  %1942 = vmatprep.subr.msk.bf16.mxu0 %vm3500_vm11, %v1940_v22 }
 0x116   : > { %v2339_v7 = vunpack.i.h.bf16 %v2337_v37  ;;  %v2338_v4 = vunpack.i.l.bf16 %v2337_v37  ;;  %v1358_v5 = vsel %vm1335_vm4, %v3347_v49, %v2343_v56 }
 0x117   : > { %2626 = vrot.lane.b32.xlu0 %v2625_v39, %s2664_s28  ;;  %v2352_v19 = vpop.permute.xlu1 %2351  ;;  %v2344_v39 = vunpack.i.h.bf16 %v2342_v2 }
 0x118   : > { %v1505_v46 = vsel %vm1500_vm9, %v1472_v15, %v2338_v4  ;;  %v1506_v28 = vsel %vm1500_vm9, %v1473_v17, %v2339_v7  ;;  %v2354_v38 = vunpack.i.h.bf16 %v2352_v19  ;;  %v2353_v53 = vunpack.i.l.bf16 %v2352_v19 }
 0x119   : > { %v1943_v10 = vpack.c.bf16 %v1506_v28, %v1505_v46  ;;  %v2347_v3 = vpop.permute.xlu0 %2346  ;;  %v1359_v62 = vsel %vm1335_vm4, %v3344_v20, %v2344_v39 }
 0x11a   : > { %v2349_v14 = vunpack.i.h.bf16 %v2347_v3  ;;  %v2348_v61 = vunpack.i.l.bf16 %v2347_v3  ;;  %v1375_v29 = vsel %vm1368_vm5, %v3418_v40, %v2353_v53  ;;  %v1376_v33 = vsel %vm1368_vm5, %v3422_v54, %v2354_v38 }
 0x11b   : > { %1945 = vmatpush3.bf16.xpose.msk.msra.mxu0 %vm3500_vm11, %v1943_v10  ;;  %v2362_v9 = vpop.permute.xlu1 %2361  ;;  %1537 = vperm.xlu0 %2635, %v1534_v63  }
 0x11c   : > { %v2364_v59 = vunpack.i.h.bf16 %v2362_v9  ;;  %v2363_v50 = vunpack.i.l.bf16 %v2362_v9  ;;  %v1392_v49 = vsel %vm1368_vm5, %v1359_v62, %v2349_v14  ;;  %v1391_v20 = vsel %vm1368_vm5, %v1358_v5, %v2348_v61 }
 0x11d   : > { %v2357_v58 = vpop.permute.xlu0 %2356 }
 0x11e   : > { %v2359_v18 = vunpack.i.h.bf16 %v2357_v58  ;;  %v2358_v51 = vunpack.i.l.bf16 %v2357_v58  ;;  %v1408_v42 = vsel %vm1401_vm6, %v1375_v29, %v2363_v50  ;;  %v1409_v36 = vsel %vm1401_vm6, %v1376_v33, %v2364_v59 }
 0x11f   : > { %v2372_v43 = vpop.permute.xlu1 %2371 }
 0x120   : > { %v2374_v47 = vunpack.i.h.bf16 %v2372_v43  ;;  %v2373_v22 = vunpack.i.l.bf16 %v2372_v43  ;;  %v1424_v40 = vsel %vm1401_vm6, %v1391_v20, %v2358_v51  ;;  %v1425_v37 = vsel %vm1401_vm6, %v1392_v49, %v2359_v18 }
 0x121   : > { %v2367_v26 = vpop.permute.xlu0 %2366 }
 0x122   : > { %v2369_v13 = vunpack.i.h.bf16 %v2367_v26  ;;  %v2368_v23 = vunpack.i.l.bf16 %v2367_v26  ;;  %v1441_v44 = vsel %vm1434_vm7, %v1408_v42, %v2373_v22  ;;  %v1442_v7 = vsel %vm1434_vm7, %v1409_v36, %v2374_v47 }
 0x123   : > { %v2382_v12 = vpop.permute.xlu1 %2381 }
 0x124   : > { %v2384_v2 = vunpack.i.h.bf16 %v2382_v12  ;;  %v2383_v24 = vunpack.i.l.bf16 %v2382_v12  ;;  %v1457_v17 = vsel %vm1434_vm7, %v1424_v40, %v2368_v23  ;;  %v1458_v19 = vsel %vm1434_vm7, %v1425_v37, %v2369_v13 }
 0x125   : > { %v2377_v34 = vpop.permute.xlu0 %2376 }
 0x126   : > { %v2379_v54 = vunpack.i.h.bf16 %v2377_v34  ;;  %v2378_v11 = vunpack.i.l.bf16 %v2377_v34  ;;  %v1474_v46 = vsel %vm1467_vm8, %v1441_v44, %v2383_v24  ;;  %v1475_v28 = vsel %vm1467_vm8, %v1442_v7, %v2384_v2 }
 0x127   : > { %v2392_v30 = vpop.permute.xlu1 %2391 }
 0x128   : > { %v2394_v4 = vunpack.i.h.bf16 %v2392_v30  ;;  %v2393_v15 = vunpack.i.l.bf16 %v2392_v30  ;;  %v1490_v58 = vsel %vm1467_vm8, %v1457_v17, %v2378_v11  ;;  %v1491_v39 = vsel %vm1467_vm8, %v1458_v19, %v2379_v54 }
 0x129   : > { %v2387_v6 = vpop.permute.xlu0 %2386 }
 0x12a   : > { %v1507_v63 = vsel %vm1500_vm9, %v1474_v46, %v2393_v15  ;;  %v1508_v10 = vsel %vm1500_vm9, %v1475_v28, %v2394_v4  ;;  %v2389_v3 = vunpack.i.h.bf16 %v2387_v6  ;;  %v2388_v9 = vunpack.i.l.bf16 %v2387_v6 }
 0x12b   : > { %v1949_v56 = vpack.c.bf16 %v1508_v10, %v1507_v63  ;;  %v2402_v43 = vpop.permute.xlu1 %2401 }
 0x12c   : > { %v1523_v38 = vsel %vm1500_vm9, %v1490_v58, %v2388_v9  ;;  %v1524_v53 = vsel %vm1500_vm9, %v1491_v39, %v2389_v3  ;;  %v2404_v5 = vunpack.i.h.bf16 %v2402_v43  ;;  %v2403_v62 = vunpack.i.l.bf16 %v2402_v43 }
 0x12d   : > { %v1946_v26 = vpack.c.bf16 %v1524_v53, %v1523_v38  ;;  %v2397_v14 = vpop.permute.xlu0 %2396 }
 0x12e   : > { %v2399_v51 = vunpack.i.h.bf16 %v2397_v14  ;;  %v2398_v12 = vunpack.i.l.bf16 %v2397_v14  ;;  %v1344_v22 = vsel %vm1335_vm4, %v3294_v35, %v2403_v62  ;;  %v1345_v13 = vsel %vm1335_vm4, %v3297_v0, %v2404_v5 }
 0x12f   : > { %1948 = vmatprep.subr.msk.bf16.mxu0 %vm3500_vm11, %v1946_v26  ;;  %v2412_v61 = vpop.permute.xlu1 %2411 }
 0x130   : > { %1951 = vmatpush3.bf16.xpose.msk.msra.mxu0 %vm3500_vm11, %v1949_v56  ;;  %v2414_v33 = vunpack.i.h.bf16 %v2412_v61  ;;  %v2413_v47 = vunpack.i.l.bf16 %v2412_v61  ;;  %v1360_v20 = vsel %vm1335_vm4, %v3376_v45, %v2398_v12  ;;  %v1361_v42 = vsel %vm1335_vm4, %v3379_v31, %v2399_v51 }
 0x131   : > { %v2407_v59 = vpop.permute.xlu0 %2406 }
 0x132   : > { %v2409_v2 = vunpack.i.h.bf16 %v2407_v59  ;;  %v2408_v24 = vunpack.i.l.bf16 %v2407_v59  ;;  %v1377_v54 = vsel %vm1368_vm5, %v1344_v22, %v2413_v47  ;;  %v1378_v35 = vsel %vm1368_vm5, %v1345_v13, %v2414_v33 }
 0x133   : > { %v2422_v50 = vpop.permute.xlu1 %2421 }
 0x134   : > { %v2424_v34 = vunpack.i.h.bf16 %v2422_v50  ;;  %v2423_v49 = vunpack.i.l.bf16 %v2422_v50  ;;  %v1393_v17 = vsel %vm1368_vm5, %v1360_v20, %v2408_v24  ;;  %v1394_v45 = vsel %vm1368_vm5, %v1361_v42, %v2409_v2 }
 0x135   : > { %v2417_v18 = vpop.permute.xlu0 %2416 }
 0x136   : > { %v2419_v36 = vunpack.i.h.bf16 %v2417_v18  ;;  %v2418_v40 = vunpack.i.l.bf16 %v2417_v18  ;;  %v1410_v31 = vsel %vm1401_vm6, %v1377_v54, %v2423_v49  ;;  %v1411_v19 = vsel %vm1401_vm6, %v1378_v35, %v2424_v34 }
 0x137   : > { %v2432_v29 = vpop.permute.xlu1 %2431 }
 0x138   : > { %v2434_v11 = vunpack.i.h.bf16 %v2432_v29  ;;  %v2433_v0 = vunpack.i.l.bf16 %v2432_v29  ;;  %v1426_v46 = vsel %vm1401_vm6, %v1393_v17, %v2418_v40  ;;  %v1427_v28 = vsel %vm1401_vm6, %v1394_v45, %v2419_v36 }
 0x139   : > { %v2427_v23 = vpop.permute.xlu0 %2426 }
 0x13a   : > { %v2429_v30 = vunpack.i.h.bf16 %v2427_v23  ;;  %v2428_v44 = vunpack.i.l.bf16 %v2427_v23  ;;  %v1443_v3 = vsel %vm1434_vm7, %v1410_v31, %v2433_v0  ;;  %v1444_v9 = vsel %vm1434_vm7, %v1411_v19, %v2434_v11 }
 0x13b   : > { %v2442_v37 = vpop.permute.xlu1 %2441 }
 0x13c   : > { %v2444_v7 = vunpack.i.h.bf16 %v2442_v37  ;;  %v2443_v4 = vunpack.i.l.bf16 %v2442_v37  ;;  %v1459_v56 = vsel %vm1434_vm7, %v1426_v46, %v2428_v44  ;;  %v1460_v43 = vsel %vm1434_vm7, %v1427_v28, %v2429_v30 }
 0x13d   : > { %v2437_v15 = vpop.permute.xlu0 %2436 }
 0x13e   : > { %v2439_v6 = vunpack.i.h.bf16 %v2437_v15  ;;  %v2438_v63 = vunpack.i.l.bf16 %v2437_v15  ;;  %v1476_v38 = vsel %vm1467_vm8, %v1443_v3, %v2443_v4  ;;  %v1477_v53 = vsel %vm1467_vm8, %v1444_v9, %v2444_v7 }
 0x13f   : > { %v2452_v10 = vpop.permute.xlu1 %2451 }
 0x140   : > { %v2454_v58 = vunpack.i.h.bf16 %v2452_v10  ;;  %v2453_v39 = vunpack.i.l.bf16 %v2452_v10  ;;  %v1492_v5 = vsel %vm1467_vm8, %v1459_v56, %v2438_v63  ;;  %v1493_v62 = vsel %vm1467_vm8, %v1460_v43, %v2439_v6 }
 0x141   : > { %v2447_v26 = vpop.permute.xlu0 %2446 }
 0x142   : > { %v1509_v14 = vsel %vm1500_vm9, %v1476_v38, %v2453_v39  ;;  %v1510_v61 = vsel %vm1500_vm9, %v1477_v53, %v2454_v58  ;;  %v2449_v59 = vunpack.i.h.bf16 %v2447_v26  ;;  %v2448_v50 = vunpack.i.l.bf16 %v2447_v26 }
 0x143   : > { %v1955_v18 = vpack.c.bf16 %v1510_v61, %v1509_v14  ;;  %v2462_v51 = vpop.permute.xlu1 %2461 }
 0x144   : > { %v1525_v12 = vsel %vm1500_vm9, %v1492_v5, %v2448_v50  ;;  %v1526_v29 = vsel %vm1500_vm9, %v1493_v62, %v2449_v59  ;;  %v2464_v2 = vunpack.i.h.bf16 %v2462_v51  ;;  %v2463_v24 = vunpack.i.l.bf16 %v2462_v51 }
 0x145   : > { %v1952_v33 = vpack.c.bf16 %v1526_v29, %v1525_v12  ;;  %v2457_v47 = vpop.permute.xlu0 %2456 }
 0x146   : > { %v2459_v49 = vunpack.i.h.bf16 %v2457_v47  ;;  %v2458_v20 = vunpack.i.l.bf16 %v2457_v47  ;;  %v1346_v37 = vsel %vm1335_vm4, %v3283_v1, %v2463_v24  ;;  %v1347_v54 = vsel %vm1335_vm4, %v3280_v57, %v2464_v2 }
 0x147   : > { %1954 = vmatprep.subr.msk.bf16.mxu0 %vm3500_vm11, %v1952_v33  ;;  %v2472_v22 = vpop.permute.xlu1 %2471 }
 0x148   : > { %1957 = vmatpush3.bf16.xpose.msk.msra.mxu0 %vm3500_vm11, %v1955_v18  ;;  %v2474_v36 = vunpack.i.h.bf16 %v2472_v22  ;;  %v2473_v40 = vunpack.i.l.bf16 %v2472_v22  ;;  %v1363_v7 = vsel %vm1335_vm4, %v3363_v48, %v2459_v49  ;;  %v1362_v4 = vsel %vm1335_vm4, %v3366_v41, %v2458_v20 }
 0x149   : > { %v2467_v13 = vpop.permute.xlu0 %2466 }
 0x14a   : > { %v2469_v11 = vunpack.i.h.bf16 %v2467_v13  ;;  %v2468_v0 = vunpack.i.l.bf16 %v2467_v13  ;;  %v1379_v31 = vsel %vm1368_vm5, %v1346_v37, %v2473_v40  ;;  %v1380_v1 = vsel %vm1368_vm5, %v1347_v54, %v2474_v36 }
 0x14b   : > { %v2482_v23 = vpop.permute.xlu1 %2481 }
 0x14c   : > { %v2484_v30 = vunpack.i.h.bf16 %v2482_v23  ;;  %v2483_v44 = vunpack.i.l.bf16 %v2482_v23  ;;  %v1395_v3 = vsel %vm1368_vm5, %v1362_v4, %v2468_v0  ;;  %v1396_v48 = vsel %vm1368_vm5, %v1363_v7, %v2469_v11 }
 0x14d   : > { %v2477_v34 = vpop.permute.xlu0 %2476 }
 0x14e   : > { %v2479_v15 = vunpack.i.h.bf16 %v2477_v34  ;;  %v2478_v17 = vunpack.i.l.bf16 %v2477_v34  ;;  %v1412_v41 = vsel %vm1401_vm6, %v1379_v31, %v2483_v44  ;;  %v1413_v9 = vsel %vm1401_vm6, %v1380_v1, %v2484_v30 }
 0x14f   : > { %v2492_v42 = vpop.permute.xlu1 %2491 }
 0x150   : > { %v2494_v19 = vunpack.i.h.bf16 %v2492_v42  ;;  %v2493_v57 = vunpack.i.l.bf16 %v2492_v42  ;;  %v1428_v58 = vsel %vm1401_vm6, %v1395_v3, %v2478_v17  ;;  %v1429_v39 = vsel %vm1401_vm6, %v1396_v48, %v2479_v15 }
 0x151   : > { %v2487_v35 = vpop.permute.xlu0 %2486 }
 0x152   : > { %v2489_v46 = vunpack.i.h.bf16 %v2487_v35  ;;  %v2488_v28 = vunpack.i.l.bf16 %v2487_v35  ;;  %v1445_v53 = vsel %vm1434_vm7, %v1412_v41, %v2493_v57  ;;  %v1446_v26 = vsel %vm1434_vm7, %v1413_v9, %v2494_v19 }
 0x153   : > { %v2502_v45 = vpop.permute.xlu1 %2501 }
 0x154   : > { %v2504_v6 = vunpack.i.h.bf16 %v2502_v45  ;;  %v2503_v63 = vunpack.i.l.bf16 %v2502_v45  ;;  %v1461_v59 = vsel %vm1434_vm7, %v1428_v58, %v2488_v28  ;;  %v1462_v50 = vsel %vm1434_vm7, %v1429_v39, %v2489_v46 }
 0x155   : > { %v2497_v10 = vpop.permute.xlu0 %2496 }
 0x156   : > { %v2499_v56 = vunpack.i.h.bf16 %v2497_v10  ;;  %v2498_v43 = vunpack.i.l.bf16 %v2497_v10  ;;  %v1478_v5 = vsel %vm1467_vm8, %v1445_v53, %v2503_v63  ;;  %v1479_v62 = vsel %vm1467_vm8, %v1446_v26, %v2504_v6 }
 0x157   : > { %v2512_v38 = vpop.permute.xlu1 %2511 }
 0x158   : > { %v2514_v14 = vunpack.i.h.bf16 %v2512_v38  ;;  %v2513_v61 = vunpack.i.l.bf16 %v2512_v38  ;;  %v1494_v47 = vsel %vm1467_vm8, %v1461_v59, %v2498_v43  ;;  %v1495_v22 = vsel %vm1467_vm8, %v1462_v50, %v2499_v56 }
 0x159   : > { %v2507_v18 = vpop.permute.xlu0 %2506 }
 0x15a   : > { %v1511_v51 = vsel %vm1500_vm9, %v1478_v5, %v2513_v61  ;;  %v1512_v12 = vsel %vm1500_vm9, %v1479_v62, %v2514_v14  ;;  %v2509_v29 = vunpack.i.h.bf16 %v2507_v18  ;;  %v2508_v33 = vunpack.i.l.bf16 %v2507_v18 }
 0x15b   : > { %v1961_v13 = vpack.c.bf16 %v1512_v12, %v1511_v51  ;;  %v2522_v23 = vpop.permute.xlu1 %2521 }
 0x15c   : > { %v1527_v2 = vsel %vm1500_vm9, %v1494_v47, %v2508_v33  ;;  %v1528_v24 = vsel %vm1500_vm9, %v1495_v22, %v2509_v29  ;;  %v2524_v40 = vunpack.i.h.bf16 %v2522_v23  ;;  %v2523_v37 = vunpack.i.l.bf16 %v2522_v23 }
 0x15d   : > { %v1958_v34 = vpack.c.bf16 %v1528_v24, %v1527_v2  ;;  %v2517_v49 = vpop.permute.xlu0 %2516 }
 0x15e   : > { %v2519_v35 = vunpack.i.h.bf16 %v2517_v49  ;;  %v2518_v11 = vunpack.i.l.bf16 %v2517_v49  ;;  %v1348_v7 = vsel %vm1335_vm4, %v3318_v8, %v2523_v37  ;;  %v1349_v4 = vsel %vm1335_vm4, %v3321_v25, %v2524_v40 }
 0x15f   : > { %1960 = vmatprep.subr.msk.bf16.mxu0 %vm3500_vm11, %v1958_v34  ;;  %v2532_v20 = vpop.permute.xlu1 %2531 }
 0x160   : > { %1963 = vmatpush3.bf16.xpose.msk.msra.mxu0 %vm3500_vm11, %v1961_v13  ;;  %v2534_v30 = vunpack.i.h.bf16 %v2532_v20  ;;  %v2533_v44 = vunpack.i.l.bf16 %v2532_v20  ;;  %v1364_v19 = vsel %vm1335_vm4, %v3402_v60, %v2518_v11  ;;  %v1365_v57 = vsel %vm1335_vm4, %v3405_v21, %v2519_v35 }
 0x161   : > { %v2527_v42 = vpop.permute.xlu0 %2526 }
 0x162   : > { %v2529_v17 = vunpack.i.h.bf16 %v2527_v42  ;;  %v2528_v45 = vunpack.i.l.bf16 %v2527_v42  ;;  %v1381_v63 = vsel %vm1368_vm5, %v1348_v7, %v2533_v44  ;;  %v1382_v8 = vsel %vm1368_vm5, %v1349_v4, %v2534_v30 }
 0x163   : > { %v2542_v36 = vpop.permute.xlu1 %2541 }
 0x164   : > { %v2544_v31 = vunpack.i.h.bf16 %v2542_v36  ;;  %v2543_v1 = vunpack.i.l.bf16 %v2542_v36  ;;  %v1397_v39 = vsel %vm1368_vm5, %v1364_v19, %v2528_v45  ;;  %v1398_v60 = vsel %vm1368_vm5, %v1365_v57, %v2529_v17 }
 0x165   : > { %v2537_v54 = vpop.permute.xlu0 %2536 }
 0x166   : > { %v2539_v46 = vunpack.i.h.bf16 %v2537_v54  ;;  %v2538_v28 = vunpack.i.l.bf16 %v2537_v54  ;;  %v1414_v21 = vsel %vm1401_vm6, %v1381_v63, %v2543_v1  ;;  %v1415_v56 = vsel %vm1401_vm6, %v1382_v8, %v2544_v31 }
 0x167   : > { %v2552_v0 = vpop.permute.xlu1 %2551 }
 0x168   : > { %v2554_v10 = vunpack.i.h.bf16 %v2552_v0  ;;  %v2553_v25 = vunpack.i.l.bf16 %v2552_v0  ;;  %v1430_v43 = vsel %vm1401_vm6, %v1397_v39, %v2538_v28  ;;  %v1431_v38 = vsel %vm1401_vm6, %v1398_v60, %v2539_v46 }
 0x169   : > { %v2547_v15 = vpop.permute.xlu0 %2546 }
 0x16a   : > { %v2549_v3 = vunpack.i.h.bf16 %v2547_v15  ;;  %v2548_v48 = vunpack.i.l.bf16 %v2547_v15  ;;  %v1447_v61 = vsel %vm1434_vm7, %v1414_v21, %v2553_v25  ;;  %v1448_v59 = vsel %vm1434_vm7, %v1415_v56, %v2554_v10 }
 0x16b   : > { %v2562_v6 = vpop.permute.xlu1 %2561 }
 0x16c   : > { %v2564_v41 = vunpack.i.h.bf16 %v2562_v6  ;;  %v2563_v9 = vunpack.i.l.bf16 %v2562_v6  ;;  %v1463_v62 = vsel %vm1434_vm7, %v1430_v43, %v2548_v48  ;;  %v1464_v18 = vsel %vm1434_vm7, %v1431_v38, %v2549_v3  ;;  %v3997_v6 = vld [vmem:[#allocation11_spill] sm:$0xff] }
 0x16d   : > { %v2557_v58 = vpop.permute.xlu0 %2556 }
 0x16e   : > { %v2559_v53 = vunpack.i.h.bf16 %v2557_v58  ;;  %v2558_v26 = vunpack.i.l.bf16 %v2557_v58  ;;  %v1480_v51 = vsel %vm1467_vm8, %v1447_v61, %v2563_v9  ;;  %v1481_v12 = vsel %vm1467_vm8, %v1448_v59, %v2564_v41 }
 0x16f   : > { %v2572_v14 = vpop.permute.xlu1 %2571 }
 0x170   : > { %v2574_v50 = vunpack.i.h.bf16 %v2572_v14  ;;  %v2573_v5 = vunpack.i.l.bf16 %v2572_v14  ;;  %v1496_v23 = vsel %vm1467_vm8, %v1463_v62, %v2558_v26  ;;  %v1497_v2 = vsel %vm1467_vm8, %v1464_v18, %v2559_v53 }
 0x171   : > { %v2567_v29 = vpop.permute.xlu0 %2566 }
 0x172   : > { %v1513_v33 = vsel %vm1500_vm9, %v1480_v51, %v2573_v5  ;;  %v1514_v47 = vsel %vm1500_vm9, %v1481_v12, %v2574_v50  ;;  %v2569_v22 = vunpack.i.h.bf16 %v2567_v29  ;;  %v2568_v13 = vunpack.i.l.bf16 %v2567_v29 }
 0x173   : > { %v1967_v24 = vpack.c.bf16 %v1514_v47, %v1513_v33  ;;  %v2582_v34 = vpop.permute.xlu1 %2581 }
 0x174   : > { %v1529_v49 = vsel %vm1500_vm9, %v1496_v23, %v2568_v13  ;;  %v1530_v20 = vsel %vm1500_vm9, %v1497_v2, %v2569_v22  ;;  %v2584_v35 = vunpack.i.h.bf16 %v2582_v34  ;;  %v2583_v11 = vunpack.i.l.bf16 %v2582_v34 }
 0x175   : > { %v1964_v42 = vpack.c.bf16 %v1530_v20, %v1529_v49  ;;  %v2577_v36 = vpop.permute.xlu0 %2576 }
 0x176   : > { %v2579_v30 = vunpack.i.h.bf16 %v2577_v36  ;;  %v2578_v44 = vunpack.i.l.bf16 %v2577_v36  ;;  %v1350_v17 = vsel %vm1335_vm4, %v3308_v27, %v2583_v11  ;;  %v1351_v45 = vsel %vm1335_vm4, %v3305_v52, %v2584_v35 }
 0x177   : > { %1966 = vmatprep.subr.msk.bf16.mxu0 %vm3500_vm11, %v1964_v42  ;;  %v2592_v40 = vpop.permute.xlu1 %2591 }
 0x178   : > { %1969 = vmatpush3.bf16.xpose.msk.msra.mxu0 %vm3500_vm11, %v1967_v24  ;;  %v2594_v4 = vunpack.i.h.bf16 %v2592_v40  ;;  %v2593_v15 = vunpack.i.l.bf16 %v2592_v40  ;;  %v1367_v28 = vsel %vm1335_vm4, %v3388_v32, %v2579_v30  ;;  %v1366_v63 = vsel %vm1335_vm4, %v3997_v6, %v2578_v44 }
 0x179   : > { %v2587_v37 = vpop.permute.xlu0 %2586 }
 0x17a   : > { %v2589_v1 = vunpack.i.h.bf16 %v2587_v37  ;;  %v2588_v19 = vunpack.i.l.bf16 %v2587_v37  ;;  %v1383_v3 = vsel %vm1368_vm5, %v1350_v17, %v2593_v15  ;;  %v1384_v27 = vsel %vm1368_vm5, %v1351_v45, %v2594_v4 }
 0x17b   : > { %v2602_v54 = vpop.permute.xlu1 %2601 }
 0x17c   : > { %v2604_v57 = vunpack.i.h.bf16 %v2602_v54  ;;  %v2603_v46 = vunpack.i.l.bf16 %v2602_v54  ;;  %v1399_v21 = vsel %vm1368_vm5, %v1366_v63, %v2588_v19  ;;  %v1400_v32 = vsel %vm1368_vm5, %v1367_v28, %v2589_v1 }
 0x17d   : > { %v2597_v0 = vpop.permute.xlu0 %2596 }
 0x17e   : > { %v2599_v8 = vunpack.i.h.bf16 %v2597_v0  ;;  %v2598_v10 = vunpack.i.l.bf16 %v2597_v0  ;;  %v1416_v56 = vsel %vm1401_vm6, %v1383_v3, %v2603_v46  ;;  %v1417_v43 = vsel %vm1401_vm6, %v1384_v27, %v2604_v57 }
 0x17f   : > { %v2612_v7 = vpop.permute.xlu1 %2611 }
 0x180   : > { %v2614_v48 = vunpack.i.h.bf16 %v2612_v7  ;;  %v2613_v52 = vunpack.i.l.bf16 %v2612_v7  ;;  %v1432_v38 = vsel %vm1401_vm6, %v1399_v21, %v2598_v10  ;;  %v1433_v53 = vsel %vm1401_vm6, %v1400_v32, %v2599_v8 }
 0x181   : > { %v2607_v31 = vpop.permute.xlu0 %2606  ;;  %v1725_v7 = vlaneseq }
 0x182   : > { %v2609_v41 = vunpack.i.h.bf16 %v2607_v31  ;;  %v2608_v9 = vunpack.i.l.bf16 %v2607_v31  ;;  %v1449_v59 = vsel %vm1434_vm7, %v1416_v56, %v2613_v52  ;;  %v1450_v50 = vsel %vm1434_vm7, %v1417_v43, %v2614_v48 }
 0x183   : > { %v2622_v25 = vpop.permute.xlu1 %2621  ;;  %v1726_v45 = vshrl.u32 %v1725_v7, 7 }
 0x184   : > { %v2624_v58 = vunpack.i.h.bf16 %v2622_v25  ;;  %v2623_v39 = vunpack.i.l.bf16 %v2622_v25  ;;  %v1465_v18 = vsel %vm1434_vm7, %v1432_v38, %v2608_v9  ;;  %v1466_v51 = vsel %vm1434_vm7, %v1433_v53, %v2609_v41 }
 0x185   : > { %v2617_v60 = vpop.permute.xlu0 %2616 }
 0x186   : > { %v2619_v26 = vunpack.i.h.bf16 %v2617_v60  ;;  %v2618_v14 = vunpack.i.l.bf16 %v2617_v60  ;;  %v1482_v12 = vsel %vm1467_vm8, %v1449_v59, %v2623_v39  ;;  %v1483_v29 = vsel %vm1467_vm8, %v1450_v50, %v2624_v58 }
 0x187   : > { %v2632_v61 = vpop.permute.xlu1 %2631  ;;  %v2666_v58 = vmov 0.0  }
 0x188   : > { %v2634_v5 = vunpack.i.h.bf16 %v2632_v61  ;;  %v2633_v62 = vunpack.i.l.bf16 %v2632_v61  ;;  %v1498_v2 = vsel %vm1467_vm8, %v1465_v18, %v2618_v14  ;;  %v1499_v24 = vsel %vm1467_vm8, %v1466_v51, %v2619_v26 }
 0x189   : > { %v2627_v33 = vpop.permute.xlu0 %2626 }
 0x18a   : > { %v1515_v47 = vsel %vm1500_vm9, %v1482_v12, %v2633_v62  ;;  %v1516_v22 = vsel %vm1500_vm9, %v1483_v29, %v2634_v5  ;;  %v2629_v13 = vunpack.i.h.bf16 %v2627_v33  ;;  %v2628_v23 = vunpack.i.l.bf16 %v2627_v33 }
 0x18b   : > { %v1973_v34 = vpack.c.bf16 %v1516_v22, %v1515_v47 }
 0x18c   : > { %v1531_v49 = vsel %vm1500_vm9, %v1498_v2, %v2628_v23  ;;  %v1532_v20 = vsel %vm1500_vm9, %v1499_v24, %v2629_v13 }
 0x18d   : > { %v1970_v42 = vpack.c.bf16 %v1532_v20, %v1531_v49 }
 0x18f   : > { %1972 = vmatprep.subr.msk.bf16.mxu0 %vm3500_vm11, %v1970_v42 }
 0x190   : > { %1975 = vmatpush3.bf16.xpose.msk.msra.mxu0 %vm3500_vm11, %v1973_v34 }
 0x197   : > { %1927 = vmatmul.mubr.msk.f32.vlgmr.msra.gmra.mrb[0].mxu0 %vm1540_vm10, %v3717_v55 }
 0x19a   : > { %v1538_v36 = vpop.permute.xlu0 %1537 }
 0x26a   : > { %v1706_v40 = vpop.f32.mrb[0].mxu0 }
 0x26b   : > { %v1707_v37 = vadd.f32 %v1706_v40, %v1538_v36  ;;  %v1708_v54 = vpop.f32.mrb[1].mxu0 }
 0x26c   : > { %v1709_v35 = vadd.f32 %v1708_v54, %v1538_v36 }
 0x26d   : > { %1711 = vst [vmem:[%s205_s10] sm:$0xff] %v1707_v37  ;;  %v1713_v11 = vrot.slane %v1707_v37, 4 }
 0x26e   : > { %1712 = vst [vmem:[%s205_s10 + $0x8] sm:$0xff] %v1709_v35  ;;  %v1719_v0 = vrot.slane %v1709_v35, 4 }
 0x26f   : > { %v1714_v16 = vmax.f32 %v1707_v37, %v1713_v11 }
 0x270   : > { %v1720_v30 = vmax.f32 %v1709_v35, %v1719_v0 }
 0x271   : > { %v1715_v44 = vrot.slane %v1714_v16, 2 }
 0x272   : > { %v1721_v55 = vrot.slane %v1720_v30, 2 }
 0x273   : > { %v1716_v4 = vmax.f32 %v1714_v16, %v1715_v44 }
 0x274   : > { %v1722_v15 = vmax.f32 %v1720_v30, %v1721_v55 }
 0x275   : > { %v1717_v17 = vrot.slane %v1716_v4, 1 }
 0x276   : > { %v1723_v31 = vrot.slane %v1722_v15, 1 }
 0x277   : > { %v1718_v1 = vmax.f32 %v1716_v4, %v1717_v17 }
 0x278   : > { %v1724_v19 = vmax.f32 %v1722_v15, %v1723_v31 }
 0x279   : > { %vm1727_vm12 = vcmp.eq.f32.partialorder %v1707_v37, %v1718_v1 }
 0x27a   : > { %v1729_v57 = vsel %vm1727_vm12, %v1726_v45, 8  ;;  %vm1728_vm13 = vcmp.eq.f32.partialorder %v1709_v35, %v1724_v19 }
 0x27b   : > { %v1731_v46 = vrot.slane %v1729_v57, 4  ;;  %v1730_v28 = vsel %vm1728_vm13, %v1726_v45, 8 }
 0x27c   : > { %v1740_v6 = vrot.slane %v1730_v28, 4 }
 0x27d   : > { %vm1732_vm14 = vcmp.lt.s32.totalorder %v1729_v57, %v1731_v46 }
 0x27e   : > { %v1733_v63 = vsel %vm1732_vm14, %v1729_v57, %v1731_v46  ;;  %vm1741_vm15 = vcmp.lt.s32.totalorder %v1730_v28, %v1740_v6 }
 0x27f   : > { %v1734_v8 = vrot.slane %v1733_v63, 2  ;;  %v1742_v10 = vsel %vm1741_vm15, %v1730_v28, %v1740_v6 }
 0x280   : > { %v1743_v25 = vrot.slane %v1742_v10, 2 }
 0x281   : > { %vm1735_vm0 = vcmp.lt.s32.totalorder %v1733_v63, %v1734_v8 }
 0x282   : > { %v1736_v3 = vsel %vm1735_vm0, %v1733_v63, %v1734_v8  ;;  %vm1744_vm1 = vcmp.lt.s32.totalorder %v1742_v10, %v1743_v25 }
 0x283   : > { %v1737_v27 = vrot.slane %v1736_v3, 1  ;;  %v1745_v48 = vsel %vm1744_vm1, %v1742_v10, %v1743_v25 }
 0x284   : > { %v1746_v52 = vrot.slane %v1745_v48, 1 }
 0x285   : > { %vm1738_vm2 = vcmp.lt.s32.totalorder %v1736_v3, %v1737_v27 }
 0x286   : > { %v1739_v41 = vsel %vm1738_vm2, %v1736_v3, %v1737_v27  ;;  %vm1747_vm3 = vcmp.lt.s32.totalorder %v1745_v48, %v1746_v52 }
 0x287   : > { %vm1749_vm4 = vcmp.eq.s32.totalorder %v1726_v45, %v1739_v41  ;;  %v1748_v9 = vsel %vm1747_vm3, %v1745_v48, %v1746_v52 }
 0x288   : > { %v1888_v39 = vsel %vm1749_vm4, 1.0, %v2666_v58  ;;  %vm1750_vm5 = vcmp.eq.s32.totalorder %v1726_v45, %v1748_v9 }
 0x289   : > { %1755 = vst [vmem:[%s210_s13] sm:$0xff] %v1888_v39  ;;  %v1889_v60 = vsel %vm1750_vm5, 1.0, %v2666_v58 }
 0x28a   : > { %1756 = vst [vmem:[%s210_s13 + $0x8] sm:$0xff] %v1889_v60 }
 0x28b PF: > { %s15_s15 = sadd.s32 1, %s2655_s15  }
 0x28c   : > { %p12_p4 = scmp.ge.s32.totalorder %s15_s15, 4  }
 0x28e   :  { %14 = sbr.rel (!%p12_p4) target bundleno = 1 (0x1), region = 74 }

// kernel: segmentation_head_forward.5
= control target key start
LH: loop header
LB: loop body
LE: loop exit
PB: predicated region body
PF: predicated region fallthrough
CT: control target
= control target key end

     0   :  { %s457_s9 = smov 0   ;;  %s459_s10 = smov 0   ;;  %s498_s0 = inlined_call_operand.vmem [shape: f32[2,8,256], index: 0, kind: input, shape index: {}]   ;;  %s499_s1 = inlined_call_operand.vmem [shape: f32[2,8,256], index: 1, kind: input, shape index: {}]   ;;  %s500_s2 = inlined_call_operand.vmem [shape: f32[2,8,256], index: 2, kind: output, shape index: {}]  }
   0x1   :  { %s461_s11 = smov 0  }
   0x2 LB: > { %s24_s12 = sadd.s32 1, %s436_s10  ;;  %p374_p0 = scmp.ge.s32.totalorder %s440_s11, 1  ;;  %s440_s11 = sphi %s461_s11, %s12_s11   ;;  %s436_s10 = sphi %s459_s10, %s502_s10   ;;  %s432_s9 = sphi %s457_s9, %s501_s9  }
   0x3   : > { %p26_p1 = scmp.ge.s32.totalorder %s24_s12, 2  ;;  %p150_p2 = scmp.lt.s32.totalorder %s440_s11, 3 }
   0x5   : > { %s504_s12 = smov (%p26_p1, %s24_s12), 0  ;;  %p151_p3 = pnand %p374_p0, %p150_p2 }
   0x6   : > { %p190_p4 = scmp.lt.s32.totalorder (!%p151_p3), %s432_s9, 1 }
   0x7   : > { %154 = sbr.rel (%p151_p3) target bundleno = 79 (0x4f), region = 28 }
   0xe   : > { %s506_s9 = smov (!%p190_p4, %s432_s9), 1 }
   0xf   : > { %s475_s13 = sshll.u32 %s506_s9, 4 }
  0x10   : > { %s197_s16 = scalar_lea.vmem %s498_s0, %s475_s13  ;;  %s207_s19 = scalar_lea.vmem %s499_s1, %s475_s13 }
  0x11   : > { %v219_v0 = vld [vmem:[%s197_s16] sm:$0xff]  ;;  %v220_v1 = vld [vmem:[%s197_s16 + $0x8] sm:$0xff]  ;;  %s217_s22 = scalar_lea.vmem %s500_s2, %s475_s13 }
  0x12   : > { %v221_v2 = vld [vmem:[%s207_s19] sm:$0xff]  ;;  %v222_v3 = vld [vmem:[%s207_s19 + $0x8] sm:$0xff] }
  0x13   : > { %v223_v4 = vmul.f32 %v221_v2, %v219_v0  ;;  %v224_v5 = vmul.f32 %v222_v3, %v220_v1 }
  0x15   : > { %v225_v6 = vadd.f32 %v223_v4, %v219_v0  ;;  %v226_v7 = vadd.f32 %v224_v5, %v220_v1 }
  0x17   : > { %v227_v8 = vrot.slane %v225_v6, 4  ;;  %v233_v9 = vrot.slane %v226_v7, 4 }
  0x19   : > { %v228_v10 = vmax.f32 %v225_v6, %v227_v8  ;;  %v234_v11 = vmax.f32 %v226_v7, %v233_v9 }
  0x1b   : > { %v229_v12 = vrot.slane %v228_v10, 2  ;;  %v235_v13 = vrot.slane %v234_v11, 2 }
  0x1d   : > { %v230_v14 = vmax.f32 %v228_v10, %v229_v12  ;;  %v236_v15 = vmax.f32 %v234_v11, %v235_v13 }
  0x1f   : > { %v231_v16 = vrot.slane %v230_v14, 1  ;;  %v237_v17 = vrot.slane %v236_v15, 1 }
  0x21   : > { %v232_v18 = vmax.f32 %v230_v14, %v231_v16  ;;  %v238_v19 = vmax.f32 %v236_v15, %v237_v17 }
  0x23   : > { %v239_v20 = vsub.f32 %v225_v6, %v232_v18  ;;  %v240_v21 = vsub.f32 %v226_v7, %v238_v19 }
  0x25   : > { %v241_v22 = vmul.f32 1.442695, %v239_v20  ;;  %v243_v23 = vmul.f32 1.442695, %v240_v21 }
  0x27   : > { %410 = vpow2.f32 %v241_v22 }
  0x28   : > { %412 = vpow2.f32 %v243_v23 }
  0x31   : > { %v411_v24 = vpop.eup %410 }
  0x32   : > { %v413_v25 = vpop.eup %412  ;;  %v245_v26 = vrot.slane %v411_v24, 4 }
  0x33   : > { %v251_v27 = vrot.slane %v413_v25, 4 }
  0x34   : > { %v246_v28 = vadd.f32 %v411_v24, %v245_v26 }
  0x35   : > { %v252_v29 = vadd.f32 %v413_v25, %v251_v27 }
  0x36   : > { %v247_v30 = vrot.slane %v246_v28, 2 }
  0x37   : > { %v253_v31 = vrot.slane %v252_v29, 2 }
  0x38   : > { %v248_v32 = vadd.f32 %v247_v30, %v246_v28 }
  0x39   : > { %v254_v33 = vadd.f32 %v253_v31, %v252_v29 }
  0x3a   : > { %v249_v34 = vrot.slane %v248_v32, 1 }
  0x3b   : > { %v255_v35 = vrot.slane %v254_v33, 1 }
  0x3c   : > { %v250_v36 = vadd.f32 %v249_v34, %v248_v32 }
  0x3d   : > { %v256_v37 = vadd.f32 %v255_v35, %v254_v33 }
  0x3e   : > { %414 = vlog2.f32 %v250_v36 }
  0x3f   : > { %416 = vlog2.f32 %v256_v37 }
  0x48   : > { %v415_v38 = vpop.eup %414 }
  0x49   : > { %v417_v39 = vpop.eup %416  ;;  %v258_v40 = vmul.f32 0.6931472, %v415_v38 }
  0x4a   : > { %v260_v41 = vmul.f32 0.6931472, %v417_v39 }
  0x4b   : > { %v261_v42 = vsub.f32 %v239_v20, %v258_v40 }
  0x4c   : > { %v262_v43 = vsub.f32 %v240_v21, %v260_v41 }
  0x4d   : > { %263 = vst [vmem:[%s217_s22] sm:$0xff] %v261_v42 }
  0x4e   : > { %264 = vst [vmem:[%s217_s22 + $0x8] sm:$0xff] %v262_v43 }
  0x4f PF: > { %s12_s11 = sadd.s32 1, %s440_s11   ;;  %s501_s9 = smov %s436_s10 }
  0x50   : > { %p9_p5 = scmp.ge.s32.totalorder %s12_s11, 4   ;;  %s502_s10 = smov %s504_s12 }
  0x52   :  { %11 = sbr.rel (!%p9_p5) target bundleno = 2 (0x2), region = 61 }

</bundles_post_ra>
